<compile_context>
chip_gen: v5e
topology: v5e:2x2
jax: 0.10.0
libtpu: 0.0.40
codegen_flags: <defaults>
</compile_context>

<pallas_src>
import math

import jax
import jax.numpy as jnp
from jax.experimental import pallas as pl
from jax.experimental.pallas import tpu as pltpu


def max_attention_kernel(x_ref, w_ref, b_ref, out_ref):
    """One (sample, Tt-tile) block.

    x_ref   : (1, d, TILE_Tt, Ts)  VMEM, NCHW block straight from HBM
    w_ref   : (d,)                 SMEM  (Linear(d,1).weight)
    b_ref   : (1,)                 SMEM  (Linear(d,1).bias)
    out_ref : (1, 2*d, TILE_Tt)    VMEM  rows [0:d]=Xpool, rows [d:2d]=context
    """
    d = x_ref.shape[1]
    ts = x_ref.shape[3]
    inv_sqrt_ts = 1.0 / math.sqrt(ts)

    # ---- attention logits: Linear(d -> 1) over channels, then tanh.
    # Scalar-weight MAC straight off the NCHW block (no reshape, no skinny
    # matmul).  Four independent partial accumulators (tree-combined) restore
    # VALU ILP instead of a serial length-d dependency chain.
    n_par = min(4, d)
    parts = [x_ref[0, c, :, :].astype(jnp.float32) * w_ref[c] for c in range(n_par)]
    for c in range(n_par, d):
        parts[c % n_par] = (parts[c % n_par]
                            + x_ref[0, c, :, :].astype(jnp.float32) * w_ref[c])
    while len(parts) > 1:                                   # tree combine
        nxt = [parts[i] + parts[i + 1] for i in range(0, len(parts) - 1, 2)]
        if len(parts) % 2:
            nxt.append(parts[-1])
        parts = nxt
    scores = jnp.tanh(parts[0] + b_ref[0])                  # (TILE_Tt, Ts)

    # ---- softmax over Ts (the lane axis).  tanh output is in [-1, 1], so the
    # usual max-subtraction is unnecessary (exp in [1/e, e]); saves one XLU
    # reduction + one subtract per slab.  Exact reciprocal: the column is tiny
    # and approx=True breaks the 1e-4 parity tolerance.
    e = jnp.exp(scores)
    denom = jnp.sum(e, axis=-1, keepdims=True)              # (TILE_Tt, 1)
    alpha = e * pl.reciprocal(denom, approx=False)          # (TILE_Tt, Ts)

    # ---- Xpool (max over Ts) and context (sum_Ts(alpha*x)/sqrt(Ts)), written
    # directly in the final (2d, Tt) layout.  Batched over 8-channel slabs:
    # full-vreg reductions and wide (8 x TILE_Tt) stores instead of per-channel
    # masked single-sublane stores; the 8-channel chunk bounds the
    # (chunk, TILE_Tt, Ts) broadcast temp in VMEM.
    ch = 8
    for c0 in range(0, d, ch):
        cc = min(ch, d - c0)
        xc = x_ref[0, c0:c0 + cc, :, :].astype(jnp.float32)  # (cc, TILE_Tt, Ts)
        out_ref[0, c0:c0 + cc, :] = jnp.max(xc, axis=-1)
        out_ref[0, d + c0:d + c0 + cc, :] = (
            jnp.sum(xc * alpha[None, :, :], axis=-1) * inv_sqrt_ts)


# ---------------------------------------------------------------------------
# Tile / VMEM sizing (padded-size accounting, per-generation VMEM budget).
# ---------------------------------------------------------------------------

def _round_up(x, m):
    return (x + m - 1) // m * m


def _padded_block_bytes(shape, itemsize):
    """VMEM footprint of one block: last dim pads to 128 lanes, second-to-last
    to the dtype's sublane tile (8 rows for 4-byte, 16 for 2-byte elements)."""
    if len(shape) == 1:
        shape = (1,) + tuple(shape)
    *lead, s, l = shape
    sub = 8 * max(1, 4 // itemsize)
    n = 1
    for v in lead:
        n *= v
    return n * _round_up(s, sub) * _round_up(l, 128) * itemsize


def _tpu_vmem_capacity_bytes():
    try:
        return int(pltpu.get_tpu_info().vmem_capacity_bytes)
    except Exception:
        return 64 * 1024 * 1024   # v7x per-TC VMEM: the most conservative gen.


def _choose_tile_tt(d, tt, ts, n_batch, itemsize, in_cap_bytes, min_grid_blocks=8):
    """Largest Tt tile that (a) divides Tt, (b) satisfies TPU block rules
    (the output block's last dim is tile_tt, so it must be a multiple of 128
    or the full Tt) and (c) keeps one *padded* input block under in_cap_bytes;
    among those, prefer a tile that still yields >= min_grid_blocks grid steps
    so both v7x TensorCores get several blocks each."""
    valid = [c for c in range(1, tt + 1)
             if tt % c == 0 and (c % 128 == 0 or c == tt)]
    fits = [c for c in valid
            if _padded_block_bytes((1, d, c, ts), itemsize) <= in_cap_bytes]
    if not fits:                 # nothing fits the cap: take the smallest valid
        fits = [min(valid)]      # tile; vmem_limit is sized from it below.
    enough = [c for c in fits if n_batch * (tt // c) >= min_grid_blocks]
    return max(enough) if enough else max(fits)


def _vmem_limit_bytes(d, tile_tt, ts, itemsize, phys_bytes):
    """Scoped-VMEM limit sized from the *padded* double-buffered blocks plus
    the kernel's f32 working set, clipped below physical VMEM."""
    in_b = _padded_block_bytes((1, d, tile_tt, ts), itemsize)
    out_b = _padded_block_bytes((1, 2 * d, tile_tt), 4)
    slab = _padded_block_bytes((tile_tt, ts), 4)          # scores / e / alpha
    chunk = _padded_block_bytes((8, tile_tt, ts), 4)      # epilogue broadcast temp
    need = 2 * (in_b + out_b) + 6 * slab + chunk + (4 << 20)
    return int(min(max(need, 32 << 20), phys_bytes * 7 // 8))


# ---------------------------------------------------------------------------
# Wrapper
# ---------------------------------------------------------------------------

def max_attention(x_nchw, w, b, *, tile_tt=None):
    """x_nchw: (N, d, Tt, Ts) f32 or bf16; w: (d,); b: () -> (N, 2d, Tt) f32.

    X is streamed in its native layout and dtype; pass bf16 to halve HBM read
    traffic (the kernel upcasts to f32 for compute)."""
    N, d, Tt, Ts = x_nchw.shape
    x = jnp.asarray(x_nchw)                       # no transpose, no forced cast
    w1 = jnp.asarray(w, jnp.float32).reshape(d)
    b1 = jnp.asarray(b, jnp.float32).reshape(1)
    itemsize = x.dtype.itemsize

    phys = _tpu_vmem_capacity_bytes()
    if tile_tt is None:
        # ~8 MiB/block on v7x (64 MiB VMEM), ~16 MiB on v5e/v6e (128 MiB VMEM):
        # large enough to amortize the ~0.35 us per-grid-step overhead while
        # the double-buffered pipeline stays well inside the budget.
        tile_tt = _choose_tile_tt(d, Tt, Ts, N, itemsize,
                                  in_cap_bytes=(phys * 3 // 4) // 6)
    assert Tt % tile_tt == 0 and (tile_tt % 128 == 0 or tile_tt == Tt)

    out = pl.pallas_call(
        max_attention_kernel,
        out_shape=jax.ShapeDtypeStruct((N, 2 * d, Tt), jnp.float32),
        grid=(N, Tt // tile_tt),
        in_specs=[
            pl.BlockSpec((1, d, tile_tt, Ts), lambda n, t: (n, 0, t, 0)),
            pl.BlockSpec(memory_space=pltpu.MemorySpace.SMEM),   # w (d,)
            pl.BlockSpec(memory_space=pltpu.MemorySpace.SMEM),   # b (1,)
        ],
        out_specs=pl.BlockSpec((1, 2 * d, tile_tt), lambda n, t: (n, 0, t)),
        compiler_params=pltpu.CompilerParams(
            dimension_semantics=("parallel", "parallel"),
            vmem_limit_bytes=_vmem_limit_bytes(d, tile_tt, Ts, itemsize, phys),
        ),
    )(x, w1, b1)
    return out


def max_attention_ref(x_nchw, w, b):
    """Pure-JAX reference mirroring the PyTorch forward (track=False)."""
    N, d, Tt, Ts = x_nchw.shape
    x32 = x_nchw.astype(jnp.float32)
    xatt = jnp.transpose(x32, (0, 2, 3, 1))                       # (N, Tt, Ts, d)
    scores = jnp.tanh(jnp.einsum("ntsd,d->nts", xatt, w) + b)     # (N, Tt, Ts)
    alpha = jax.nn.softmax(scores, axis=2)
    ctx = jnp.mean(alpha[..., None] * xatt, axis=2)               # (N, Tt, d)
    ctx = jnp.transpose(ctx, (0, 2, 1)) * math.sqrt(Ts)           # (N, d, Tt)
    pool = jnp.max(x32, axis=3)                                   # (N, d, Tt)
    return jnp.concatenate([pool, ctx], axis=1)


if __name__ == "__main__":
    # Small shapes consistent with the module: X is (N, d, Tt, Ts).
    # TODO(synk): track=True path (host-side NumPy alignment tracking) and the
    # 'truncated-max' aggregator are not translated; forward here is the
    # track=False, first_aggregator='max' path (dropout is never applied in
    # the reference forward).
    N, d, Tt, Ts = 2, 32, 8, 16
    key = jax.random.PRNGKey(0)
    kx, kw, kb = jax.random.split(key, 3)

    x = jax.random.normal(kx, (N, d, Tt, Ts), dtype=jnp.float32)
    bound = 1.0 / math.sqrt(d)   # torch-like Linear(d, 1) init scale
    w = jax.random.uniform(kw, (d,), minval=-bound, maxval=bound, dtype=jnp.float32)
    b = jax.random.uniform(kb, (), minval=-bound, maxval=bound, dtype=jnp.float32)

    ref = max_attention_ref(x, w, b)

    # f32 streaming: exact parity with the reference forward.
    out = jax.block_until_ready(max_attention(x, w, b))
    assert out.shape == (N, 2 * d, Tt), out.shape
    err32 = float(jnp.max(jnp.abs(out - ref)))
    assert jnp.allclose(out, ref, atol=1e-4, rtol=1e-4), err32

    # bf16 streaming: halves HBM read traffic; compute stays f32 in-kernel.
    out_bf16 = jax.block_until_ready(max_attention(x.astype(jnp.bfloat16), w, b))
    errbf = float(jnp.max(jnp.abs(out_bf16 - ref)))
    assert jnp.allclose(out_bf16, ref, atol=5e-2, rtol=5e-2), errbf

    print("KERNEL_OK")
</pallas_src>

<mosaic_0001>
module attributes {stable_mosaic.version = 11 : i64} {
  func.func @max_attention_kernel(%arg0: i32, %arg1: i32, %arg2: memref<1x32x8x16xf32, #tpu.memory_space<vmem>>, %arg3: memref<32xf32, #tpu.memory_space<smem>>, %arg4: memref<1xf32, #tpu.memory_space<smem>>, %arg5: memref<1x64x8xf32, #tpu.memory_space<vmem>>) attributes {dimension_semantics = [#tpu.dimension_semantics<parallel>, #tpu.dimension_semantics<parallel>], iteration_bounds = array<i64: 2, 1>, scalar_prefetch = 0 : i64, scratch_operands = 0 : i64, tpu.core_type = #tpu.core_type<tc>, window_params = [{transform_indices = @transform_0, window_bounds = array<i64: 1, 32, 8, 16>}, {transform_indices = @transform_1, window_bounds = array<i64: 32>}, {transform_indices = @transform_2, window_bounds = array<i64: 1>}, {transform_indices = @transform_3, window_bounds = array<i64: 1, 64, 8>}]} {
    %c0 = arith.constant 0 : index
    %c0_0 = arith.constant 0 : index
    %c0_1 = arith.constant 0 : index
    %c0_2 = arith.constant 0 : index
    %0 = vector.load %arg2[%c0, %c0_0, %c0_1, %c0_2] : memref<1x32x8x16xf32, #tpu.memory_space<vmem>>, vector<1x1x8x16xf32>
    %1 = vector.shape_cast %0 : vector<1x1x8x16xf32> to vector<8x16xf32>
    %c0_3 = arith.constant 0 : index
    %2 = memref.load %arg3[%c0_3] : memref<32xf32, #tpu.memory_space<smem>>
    %3 = vector.broadcast %2 : f32 to vector<8x16xf32>
    %4 = arith.mulf %1, %3 : vector<8x16xf32>
    %c0_4 = arith.constant 0 : index
    %c1 = arith.constant 1 : index
    %c0_5 = arith.constant 0 : index
    %c0_6 = arith.constant 0 : index
    %5 = vector.load %arg2[%c0_4, %c1, %c0_5, %c0_6] : memref<1x32x8x16xf32, #tpu.memory_space<vmem>>, vector<1x1x8x16xf32>
    %6 = vector.shape_cast %5 : vector<1x1x8x16xf32> to vector<8x16xf32>
    %c1_7 = arith.constant 1 : index
    %7 = memref.load %arg3[%c1_7] : memref<32xf32, #tpu.memory_space<smem>>
    %8 = vector.broadcast %7 : f32 to vector<8x16xf32>
    %9 = arith.mulf %6, %8 : vector<8x16xf32>
    %c0_8 = arith.constant 0 : index
    %c2 = arith.constant 2 : index
    %c0_9 = arith.constant 0 : index
    %c0_10 = arith.constant 0 : index
    %10 = vector.load %arg2[%c0_8, %c2, %c0_9, %c0_10] : memref<1x32x8x16xf32, #tpu.memory_space<vmem>>, vector<1x1x8x16xf32>
    %11 = vector.shape_cast %10 : vector<1x1x8x16xf32> to vector<8x16xf32>
    %c2_11 = arith.constant 2 : index
    %12 = memref.load %arg3[%c2_11] : memref<32xf32, #tpu.memory_space<smem>>
    %13 = vector.broadcast %12 : f32 to vector<8x16xf32>
    %14 = arith.mulf %11, %13 : vector<8x16xf32>
    %c0_12 = arith.constant 0 : index
    %c3 = arith.constant 3 : index
    %c0_13 = arith.constant 0 : index
    %c0_14 = arith.constant 0 : index
    %15 = vector.load %arg2[%c0_12, %c3, %c0_13, %c0_14] : memref<1x32x8x16xf32, #tpu.memory_space<vmem>>, vector<1x1x8x16xf32>
    %16 = vector.shape_cast %15 : vector<1x1x8x16xf32> to vector<8x16xf32>
    %c3_15 = arith.constant 3 : index
    %17 = memref.load %arg3[%c3_15] : memref<32xf32, #tpu.memory_space<smem>>
    %18 = vector.broadcast %17 : f32 to vector<8x16xf32>
    %19 = arith.mulf %16, %18 : vector<8x16xf32>
    %c0_16 = arith.constant 0 : index
    %c4 = arith.constant 4 : index
    %c0_17 = arith.constant 0 : index
    %c0_18 = arith.constant 0 : index
    %20 = vector.load %arg2[%c0_16, %c4, %c0_17, %c0_18] : memref<1x32x8x16xf32, #tpu.memory_space<vmem>>, vector<1x1x8x16xf32>
    %21 = vector.shape_cast %20 : vector<1x1x8x16xf32> to vector<8x16xf32>
    %c4_19 = arith.constant 4 : index
    %22 = memref.load %arg3[%c4_19] : memref<32xf32, #tpu.memory_space<smem>>
    %23 = vector.broadcast %22 : f32 to vector<8x16xf32>
    %24 = arith.mulf %21, %23 : vector<8x16xf32>
    %25 = arith.addf %4, %24 : vector<8x16xf32>
    %c0_20 = arith.constant 0 : index
    %c5 = arith.constant 5 : index
    %c0_21 = arith.constant 0 : index
    %c0_22 = arith.constant 0 : index
    %26 = vector.load %arg2[%c0_20, %c5, %c0_21, %c0_22] : memref<1x32x8x16xf32, #tpu.memory_space<vmem>>, vector<1x1x8x16xf32>
    %27 = vector.shape_cast %26 : vector<1x1x8x16xf32> to vector<8x16xf32>
    %c5_23 = arith.constant 5 : index
    %28 = memref.load %arg3[%c5_23] : memref<32xf32, #tpu.memory_space<smem>>
    %29 = vector.broadcast %28 : f32 to vector<8x16xf32>
    %30 = arith.mulf %27, %29 : vector<8x16xf32>
    %31 = arith.addf %9, %30 : vector<8x16xf32>
    %c0_24 = arith.constant 0 : index
    %c6 = arith.constant 6 : index
    %c0_25 = arith.constant 0 : index
    %c0_26 = arith.constant 0 : index
    %32 = vector.load %arg2[%c0_24, %c6, %c0_25, %c0_26] : memref<1x32x8x16xf32, #tpu.memory_space<vmem>>, vector<1x1x8x16xf32>
    %33 = vector.shape_cast %32 : vector<1x1x8x16xf32> to vector<8x16xf32>
    %c6_27 = arith.constant 6 : index
    %34 = memref.load %arg3[%c6_27] : memref<32xf32, #tpu.memory_space<smem>>
    %35 = vector.broadcast %34 : f32 to vector<8x16xf32>
    %36 = arith.mulf %33, %35 : vector<8x16xf32>
    %37 = arith.addf %14, %36 : vector<8x16xf32>
    %c0_28 = arith.constant 0 : index
    %c7 = arith.constant 7 : index
    %c0_29 = arith.constant 0 : index
    %c0_30 = arith.constant 0 : index
    %38 = vector.load %arg2[%c0_28, %c7, %c0_29, %c0_30] : memref<1x32x8x16xf32, #tpu.memory_space<vmem>>, vector<1x1x8x16xf32>
    %39 = vector.shape_cast %38 : vector<1x1x8x16xf32> to vector<8x16xf32>
    %c7_31 = arith.constant 7 : index
    %40 = memref.load %arg3[%c7_31] : memref<32xf32, #tpu.memory_space<smem>>
    %41 = vector.broadcast %40 : f32 to vector<8x16xf32>
    %42 = arith.mulf %39, %41 : vector<8x16xf32>
    %43 = arith.addf %19, %42 : vector<8x16xf32>
    %c0_32 = arith.constant 0 : index
    %c8 = arith.constant 8 : index
    %c0_33 = arith.constant 0 : index
    %c0_34 = arith.constant 0 : index
    %44 = vector.load %arg2[%c0_32, %c8, %c0_33, %c0_34] : memref<1x32x8x16xf32, #tpu.memory_space<vmem>>, vector<1x1x8x16xf32>
    %45 = vector.shape_cast %44 : vector<1x1x8x16xf32> to vector<8x16xf32>
    %c8_35 = arith.constant 8 : index
    %46 = memref.load %arg3[%c8_35] : memref<32xf32, #tpu.memory_space<smem>>
    %47 = vector.broadcast %46 : f32 to vector<8x16xf32>
    %48 = arith.mulf %45, %47 : vector<8x16xf32>
    %49 = arith.addf %25, %48 : vector<8x16xf32>
    %c0_36 = arith.constant 0 : index
    %c9 = arith.constant 9 : index
    %c0_37 = arith.constant 0 : index
    %c0_38 = arith.constant 0 : index
    %50 = vector.load %arg2[%c0_36, %c9, %c0_37, %c0_38] : memref<1x32x8x16xf32, #tpu.memory_space<vmem>>, vector<1x1x8x16xf32>
    %51 = vector.shape_cast %50 : vector<1x1x8x16xf32> to vector<8x16xf32>
    %c9_39 = arith.constant 9 : index
    %52 = memref.load %arg3[%c9_39] : memref<32xf32, #tpu.memory_space<smem>>
    %53 = vector.broadcast %52 : f32 to vector<8x16xf32>
    %54 = arith.mulf %51, %53 : vector<8x16xf32>
    %55 = arith.addf %31, %54 : vector<8x16xf32>
    %c0_40 = arith.constant 0 : index
    %c10 = arith.constant 10 : index
    %c0_41 = arith.constant 0 : index
    %c0_42 = arith.constant 0 : index
    %56 = vector.load %arg2[%c0_40, %c10, %c0_41, %c0_42] : memref<1x32x8x16xf32, #tpu.memory_space<vmem>>, vector<1x1x8x16xf32>
    %57 = vector.shape_cast %56 : vector<1x1x8x16xf32> to vector<8x16xf32>
    %c10_43 = arith.constant 10 : index
    %58 = memref.load %arg3[%c10_43] : memref<32xf32, #tpu.memory_space<smem>>
    %59 = vector.broadcast %58 : f32 to vector<8x16xf32>
    %60 = arith.mulf %57, %59 : vector<8x16xf32>
    %61 = arith.addf %37, %60 : vector<8x16xf32>
    %c0_44 = arith.constant 0 : index
    %c11 = arith.constant 11 : index
    %c0_45 = arith.constant 0 : index
    %c0_46 = arith.constant 0 : index
    %62 = vector.load %arg2[%c0_44, %c11, %c0_45, %c0_46] : memref<1x32x8x16xf32, #tpu.memory_space<vmem>>, vector<1x1x8x16xf32>
    %63 = vector.shape_cast %62 : vector<1x1x8x16xf32> to vector<8x16xf32>
    %c11_47 = arith.constant 11 : index
    %64 = memref.load %arg3[%c11_47] : memref<32xf32, #tpu.memory_space<smem>>
    %65 = vector.broadcast %64 : f32 to vector<8x16xf32>
    %66 = arith.mulf %63, %65 : vector<8x16xf32>
    %67 = arith.addf %43, %66 : vector<8x16xf32>
    %c0_48 = arith.constant 0 : index
    %c12 = arith.constant 12 : index
    %c0_49 = arith.constant 0 : index
    %c0_50 = arith.constant 0 : index
    %68 = vector.load %arg2[%c0_48, %c12, %c0_49, %c0_50] : memref<1x32x8x16xf32, #tpu.memory_space<vmem>>, vector<1x1x8x16xf32>
    %69 = vector.shape_cast %68 : vector<1x1x8x16xf32> to vector<8x16xf32>
    %c12_51 = arith.constant 12 : index
    %70 = memref.load %arg3[%c12_51] : memref<32xf32, #tpu.memory_space<smem>>
    %71 = vector.broadcast %70 : f32 to vector<8x16xf32>
    %72 = arith.mulf %69, %71 : vector<8x16xf32>
    %73 = arith.addf %49, %72 : vector<8x16xf32>
    %c0_52 = arith.constant 0 : index
    %c13 = arith.constant 13 : index
    %c0_53 = arith.constant 0 : index
    %c0_54 = arith.constant 0 : index
    %74 = vector.load %arg2[%c0_52, %c13, %c0_53, %c0_54] : memref<1x32x8x16xf32, #tpu.memory_space<vmem>>, vector<1x1x8x16xf32>
    %75 = vector.shape_cast %74 : vector<1x1x8x16xf32> to vector<8x16xf32>
    %c13_55 = arith.constant 13 : index
    %76 = memref.load %arg3[%c13_55] : memref<32xf32, #tpu.memory_space<smem>>
    %77 = vector.broadcast %76 : f32 to vector<8x16xf32>
    %78 = arith.mulf %75, %77 : vector<8x16xf32>
    %79 = arith.addf %55, %78 : vector<8x16xf32>
    %c0_56 = arith.constant 0 : index
    %c14 = arith.constant 14 : index
    %c0_57 = arith.constant 0 : index
    %c0_58 = arith.constant 0 : index
    %80 = vector.load %arg2[%c0_56, %c14, %c0_57, %c0_58] : memref<1x32x8x16xf32, #tpu.memory_space<vmem>>, vector<1x1x8x16xf32>
    %81 = vector.shape_cast %80 : vector<1x1x8x16xf32> to vector<8x16xf32>
    %c14_59 = arith.constant 14 : index
    %82 = memref.load %arg3[%c14_59] : memref<32xf32, #tpu.memory_space<smem>>
    %83 = vector.broadcast %82 : f32 to vector<8x16xf32>
    %84 = arith.mulf %81, %83 : vector<8x16xf32>
    %85 = arith.addf %61, %84 : vector<8x16xf32>
    %c0_60 = arith.constant 0 : index
    %c15 = arith.constant 15 : index
    %c0_61 = arith.constant 0 : index
    %c0_62 = arith.constant 0 : index
    %86 = vector.load %arg2[%c0_60, %c15, %c0_61, %c0_62] : memref<1x32x8x16xf32, #tpu.memory_space<vmem>>, vector<1x1x8x16xf32>
    %87 = vector.shape_cast %86 : vector<1x1x8x16xf32> to vector<8x16xf32>
    %c15_63 = arith.constant 15 : index
    %88 = memref.load %arg3[%c15_63] : memref<32xf32, #tpu.memory_space<smem>>
    %89 = vector.broadcast %88 : f32 to vector<8x16xf32>
    %90 = arith.mulf %87, %89 : vector<8x16xf32>
    %91 = arith.addf %67, %90 : vector<8x16xf32>
    %c0_64 = arith.constant 0 : index
    %c16 = arith.constant 16 : index
    %c0_65 = arith.constant 0 : index
    %c0_66 = arith.constant 0 : index
    %92 = vector.load %arg2[%c0_64, %c16, %c0_65, %c0_66] : memref<1x32x8x16xf32, #tpu.memory_space<vmem>>, vector<1x1x8x16xf32>
    %93 = vector.shape_cast %92 : vector<1x1x8x16xf32> to vector<8x16xf32>
    %c16_67 = arith.constant 16 : index
    %94 = memref.load %arg3[%c16_67] : memref<32xf32, #tpu.memory_space<smem>>
    %95 = vector.broadcast %94 : f32 to vector<8x16xf32>
    %96 = arith.mulf %93, %95 : vector<8x16xf32>
    %97 = arith.addf %73, %96 : vector<8x16xf32>
    %c0_68 = arith.constant 0 : index
    %c17 = arith.constant 17 : index
    %c0_69 = arith.constant 0 : index
    %c0_70 = arith.constant 0 : index
    %98 = vector.load %arg2[%c0_68, %c17, %c0_69, %c0_70] : memref<1x32x8x16xf32, #tpu.memory_space<vmem>>, vector<1x1x8x16xf32>
    %99 = vector.shape_cast %98 : vector<1x1x8x16xf32> to vector<8x16xf32>
    %c17_71 = arith.constant 17 : index
    %100 = memref.load %arg3[%c17_71] : memref<32xf32, #tpu.memory_space<smem>>
    %101 = vector.broadcast %100 : f32 to vector<8x16xf32>
    %102 = arith.mulf %99, %101 : vector<8x16xf32>
    %103 = arith.addf %79, %102 : vector<8x16xf32>
    %c0_72 = arith.constant 0 : index
    %c18 = arith.constant 18 : index
    %c0_73 = arith.constant 0 : index
    %c0_74 = arith.constant 0 : index
    %104 = vector.load %arg2[%c0_72, %c18, %c0_73, %c0_74] : memref<1x32x8x16xf32, #tpu.memory_space<vmem>>, vector<1x1x8x16xf32>
    %105 = vector.shape_cast %104 : vector<1x1x8x16xf32> to vector<8x16xf32>
    %c18_75 = arith.constant 18 : index
    %106 = memref.load %arg3[%c18_75] : memref<32xf32, #tpu.memory_space<smem>>
    %107 = vector.broadcast %106 : f32 to vector<8x16xf32>
    %108 = arith.mulf %105, %107 : vector<8x16xf32>
    %109 = arith.addf %85, %108 : vector<8x16xf32>
    %c0_76 = arith.constant 0 : index
    %c19 = arith.constant 19 : index
    %c0_77 = arith.constant 0 : index
    %c0_78 = arith.constant 0 : index
    %110 = vector.load %arg2[%c0_76, %c19, %c0_77, %c0_78] : memref<1x32x8x16xf32, #tpu.memory_space<vmem>>, vector<1x1x8x16xf32>
    %111 = vector.shape_cast %110 : vector<1x1x8x16xf32> to vector<8x16xf32>
    %c19_79 = arith.constant 19 : index
    %112 = memref.load %arg3[%c19_79] : memref<32xf32, #tpu.memory_space<smem>>
    %113 = vector.broadcast %112 : f32 to vector<8x16xf32>
    %114 = arith.mulf %111, %113 : vector<8x16xf32>
    %115 = arith.addf %91, %114 : vector<8x16xf32>
    %c0_80 = arith.constant 0 : index
    %c20 = arith.constant 20 : index
    %c0_81 = arith.constant 0 : index
    %c0_82 = arith.constant 0 : index
    %116 = vector.load %arg2[%c0_80, %c20, %c0_81, %c0_82] : memref<1x32x8x16xf32, #tpu.memory_space<vmem>>, vector<1x1x8x16xf32>
    %117 = vector.shape_cast %116 : vector<1x1x8x16xf32> to vector<8x16xf32>
    %c20_83 = arith.constant 20 : index
    %118 = memref.load %arg3[%c20_83] : memref<32xf32, #tpu.memory_space<smem>>
    %119 = vector.broadcast %118 : f32 to vector<8x16xf32>
    %120 = arith.mulf %117, %119 : vector<8x16xf32>
    %121 = arith.addf %97, %120 : vector<8x16xf32>
    %c0_84 = arith.constant 0 : index
    %c21 = arith.constant 21 : index
    %c0_85 = arith.constant 0 : index
    %c0_86 = arith.constant 0 : index
    %122 = vector.load %arg2[%c0_84, %c21, %c0_85, %c0_86] : memref<1x32x8x16xf32, #tpu.memory_space<vmem>>, vector<1x1x8x16xf32>
    %123 = vector.shape_cast %122 : vector<1x1x8x16xf32> to vector<8x16xf32>
    %c21_87 = arith.constant 21 : index
    %124 = memref.load %arg3[%c21_87] : memref<32xf32, #tpu.memory_space<smem>>
    %125 = vector.broadcast %124 : f32 to vector<8x16xf32>
    %126 = arith.mulf %123, %125 : vector<8x16xf32>
    %127 = arith.addf %103, %126 : vector<8x16xf32>
    %c0_88 = arith.constant 0 : index
    %c22 = arith.constant 22 : index
    %c0_89 = arith.constant 0 : index
    %c0_90 = arith.constant 0 : index
    %128 = vector.load %arg2[%c0_88, %c22, %c0_89, %c0_90] : memref<1x32x8x16xf32, #tpu.memory_space<vmem>>, vector<1x1x8x16xf32>
    %129 = vector.shape_cast %128 : vector<1x1x8x16xf32> to vector<8x16xf32>
    %c22_91 = arith.constant 22 : index
    %130 = memref.load %arg3[%c22_91] : memref<32xf32, #tpu.memory_space<smem>>
    %131 = vector.broadcast %130 : f32 to vector<8x16xf32>
    %132 = arith.mulf %129, %131 : vector<8x16xf32>
    %133 = arith.addf %109, %132 : vector<8x16xf32>
    %c0_92 = arith.constant 0 : index
    %c23 = arith.constant 23 : index
    %c0_93 = arith.constant 0 : index
    %c0_94 = arith.constant 0 : index
    %134 = vector.load %arg2[%c0_92, %c23, %c0_93, %c0_94] : memref<1x32x8x16xf32, #tpu.memory_space<vmem>>, vector<1x1x8x16xf32>
    %135 = vector.shape_cast %134 : vector<1x1x8x16xf32> to vector<8x16xf32>
    %c23_95 = arith.constant 23 : index
    %136 = memref.load %arg3[%c23_95] : memref<32xf32, #tpu.memory_space<smem>>
    %137 = vector.broadcast %136 : f32 to vector<8x16xf32>
    %138 = arith.mulf %135, %137 : vector<8x16xf32>
    %139 = arith.addf %115, %138 : vector<8x16xf32>
    %c0_96 = arith.constant 0 : index
    %c24 = arith.constant 24 : index
    %c0_97 = arith.constant 0 : index
    %c0_98 = arith.constant 0 : index
    %140 = vector.load %arg2[%c0_96, %c24, %c0_97, %c0_98] : memref<1x32x8x16xf32, #tpu.memory_space<vmem>>, vector<1x1x8x16xf32>
    %141 = vector.shape_cast %140 : vector<1x1x8x16xf32> to vector<8x16xf32>
    %c24_99 = arith.constant 24 : index
    %142 = memref.load %arg3[%c24_99] : memref<32xf32, #tpu.memory_space<smem>>
    %143 = vector.broadcast %142 : f32 to vector<8x16xf32>
    %144 = arith.mulf %141, %143 : vector<8x16xf32>
    %145 = arith.addf %121, %144 : vector<8x16xf32>
    %c0_100 = arith.constant 0 : index
    %c25 = arith.constant 25 : index
    %c0_101 = arith.constant 0 : index
    %c0_102 = arith.constant 0 : index
    %146 = vector.load %arg2[%c0_100, %c25, %c0_101, %c0_102] : memref<1x32x8x16xf32, #tpu.memory_space<vmem>>, vector<1x1x8x16xf32>
    %147 = vector.shape_cast %146 : vector<1x1x8x16xf32> to vector<8x16xf32>
    %c25_103 = arith.constant 25 : index
    %148 = memref.load %arg3[%c25_103] : memref<32xf32, #tpu.memory_space<smem>>
    %149 = vector.broadcast %148 : f32 to vector<8x16xf32>
    %150 = arith.mulf %147, %149 : vector<8x16xf32>
    %151 = arith.addf %127, %150 : vector<8x16xf32>
    %c0_104 = arith.constant 0 : index
    %c26 = arith.constant 26 : index
    %c0_105 = arith.constant 0 : index
    %c0_106 = arith.constant 0 : index
    %152 = vector.load %arg2[%c0_104, %c26, %c0_105, %c0_106] : memref<1x32x8x16xf32, #tpu.memory_space<vmem>>, vector<1x1x8x16xf32>
    %153 = vector.shape_cast %152 : vector<1x1x8x16xf32> to vector<8x16xf32>
    %c26_107 = arith.constant 26 : index
    %154 = memref.load %arg3[%c26_107] : memref<32xf32, #tpu.memory_space<smem>>
    %155 = vector.broadcast %154 : f32 to vector<8x16xf32>
    %156 = arith.mulf %153, %155 : vector<8x16xf32>
    %157 = arith.addf %133, %156 : vector<8x16xf32>
    %c0_108 = arith.constant 0 : index
    %c27 = arith.constant 27 : index
    %c0_109 = arith.constant 0 : index
    %c0_110 = arith.constant 0 : index
    %158 = vector.load %arg2[%c0_108, %c27, %c0_109, %c0_110] : memref<1x32x8x16xf32, #tpu.memory_space<vmem>>, vector<1x1x8x16xf32>
    %159 = vector.shape_cast %158 : vector<1x1x8x16xf32> to vector<8x16xf32>
    %c27_111 = arith.constant 27 : index
    %160 = memref.load %arg3[%c27_111] : memref<32xf32, #tpu.memory_space<smem>>
    %161 = vector.broadcast %160 : f32 to vector<8x16xf32>
    %162 = arith.mulf %159, %161 : vector<8x16xf32>
    %163 = arith.addf %139, %162 : vector<8x16xf32>
    %c0_112 = arith.constant 0 : index
    %c28 = arith.constant 28 : index
    %c0_113 = arith.constant 0 : index
    %c0_114 = arith.constant 0 : index
    %164 = vector.load %arg2[%c0_112, %c28, %c0_113, %c0_114] : memref<1x32x8x16xf32, #tpu.memory_space<vmem>>, vector<1x1x8x16xf32>
    %165 = vector.shape_cast %164 : vector<1x1x8x16xf32> to vector<8x16xf32>
    %c28_115 = arith.constant 28 : index
    %166 = memref.load %arg3[%c28_115] : memref<32xf32, #tpu.memory_space<smem>>
    %167 = vector.broadcast %166 : f32 to vector<8x16xf32>
    %168 = arith.mulf %165, %167 : vector<8x16xf32>
    %169 = arith.addf %145, %168 : vector<8x16xf32>
    %c0_116 = arith.constant 0 : index
    %c29 = arith.constant 29 : index
    %c0_117 = arith.constant 0 : index
    %c0_118 = arith.constant 0 : index
    %170 = vector.load %arg2[%c0_116, %c29, %c0_117, %c0_118] : memref<1x32x8x16xf32, #tpu.memory_space<vmem>>, vector<1x1x8x16xf32>
    %171 = vector.shape_cast %170 : vector<1x1x8x16xf32> to vector<8x16xf32>
    %c29_119 = arith.constant 29 : index
    %172 = memref.load %arg3[%c29_119] : memref<32xf32, #tpu.memory_space<smem>>
    %173 = vector.broadcast %172 : f32 to vector<8x16xf32>
    %174 = arith.mulf %171, %173 : vector<8x16xf32>
    %175 = arith.addf %151, %174 : vector<8x16xf32>
    %c0_120 = arith.constant 0 : index
    %c30 = arith.constant 30 : index
    %c0_121 = arith.constant 0 : index
    %c0_122 = arith.constant 0 : index
    %176 = vector.load %arg2[%c0_120, %c30, %c0_121, %c0_122] : memref<1x32x8x16xf32, #tpu.memory_space<vmem>>, vector<1x1x8x16xf32>
    %177 = vector.shape_cast %176 : vector<1x1x8x16xf32> to vector<8x16xf32>
    %c30_123 = arith.constant 30 : index
    %178 = memref.load %arg3[%c30_123] : memref<32xf32, #tpu.memory_space<smem>>
    %179 = vector.broadcast %178 : f32 to vector<8x16xf32>
    %180 = arith.mulf %177, %179 : vector<8x16xf32>
    %181 = arith.addf %157, %180 : vector<8x16xf32>
    %c0_124 = arith.constant 0 : index
    %c31 = arith.constant 31 : index
    %c0_125 = arith.constant 0 : index
    %c0_126 = arith.constant 0 : index
    %182 = vector.load %arg2[%c0_124, %c31, %c0_125, %c0_126] : memref<1x32x8x16xf32, #tpu.memory_space<vmem>>, vector<1x1x8x16xf32>
    %183 = vector.shape_cast %182 : vector<1x1x8x16xf32> to vector<8x16xf32>
    %c31_127 = arith.constant 31 : index
    %184 = memref.load %arg3[%c31_127] : memref<32xf32, #tpu.memory_space<smem>>
    %185 = vector.broadcast %184 : f32 to vector<8x16xf32>
    %186 = arith.mulf %183, %185 : vector<8x16xf32>
    %187 = arith.addf %163, %186 : vector<8x16xf32>
    %188 = arith.addf %169, %175 : vector<8x16xf32>
    %189 = arith.addf %181, %187 : vector<8x16xf32>
    %190 = arith.addf %188, %189 : vector<8x16xf32>
    %c0_128 = arith.constant 0 : index
    %191 = memref.load %arg4[%c0_128] : memref<1xf32, #tpu.memory_space<smem>>
    %192 = vector.broadcast %191 : f32 to vector<8x16xf32>
    %193 = arith.addf %190, %192 : vector<8x16xf32>
    %194 = math.tanh %193 : vector<8x16xf32>
    %195 = math.exp %194 : vector<8x16xf32>
    %cst = arith.constant dense<0.000000e+00> : vector<8xf32>
    %196 = vector.multi_reduction <add>, %195, %cst [1] : vector<8x16xf32> to vector<8xf32>
    %197 = vector.shape_cast %196 : vector<8xf32> to vector<8x1xf32>
    %198 = tpu.reciprocal %197 : vector<8x1xf32> -> vector<8x1xf32>
    %199 = vector.broadcast %198 : vector<8x1xf32> to vector<8x16xf32>
    %200 = arith.mulf %195, %199 : vector<8x16xf32>
    %c0_129 = arith.constant 0 : index
    %c0_130 = arith.constant 0 : index
    %c0_131 = arith.constant 0 : index
    %c0_132 = arith.constant 0 : index
    %201 = vector.load %arg2[%c0_129, %c0_130, %c0_131, %c0_132] : memref<1x32x8x16xf32, #tpu.memory_space<vmem>>, vector<1x8x8x16xf32>
    %202 = vector.shape_cast %201 : vector<1x8x8x16xf32> to vector<8x8x16xf32>
    %cst_133 = arith.constant dense<0xFF800000> : vector<8x8xf32>
    %203 = vector.multi_reduction <maximumf>, %202, %cst_133 [2] : vector<8x8x16xf32> to vector<8x8xf32>
    %c0_134 = arith.constant 0 : index
    %c0_135 = arith.constant 0 : index
    %c0_136 = arith.constant 0 : index
    %204 = vector.load %arg5[%c0_134, %c0_135, %c0_136] : memref<1x64x8xf32, #tpu.memory_space<vmem>>, vector<1x8x8xf32>
    %205 = vector.shape_cast %204 : vector<1x8x8xf32> to vector<8x8xf32>
    %206 = vector.shape_cast %203 : vector<8x8xf32> to vector<1x8x8xf32>
    tpu.vector_store %arg5[%c0_134, %c0_135, %c0_136], %206 {strides = array<i32>} : memref<1x64x8xf32, #tpu.memory_space<vmem>>, vector<1x8x8xf32>,
    %207 = vector.shape_cast %200 : vector<8x16xf32> to vector<1x8x16xf32>
    %208 = vector.broadcast %207 : vector<1x8x16xf32> to vector<8x8x16xf32>
    %209 = arith.mulf %202, %208 : vector<8x8x16xf32>
    %cst_137 = arith.constant dense<0.000000e+00> : vector<8x8xf32>
    %210 = vector.multi_reduction <add>, %209, %cst_137 [2] : vector<8x8x16xf32> to vector<8x8xf32>
    %cst_138 = arith.constant 2.500000e-01 : f32
    %211 = vector.broadcast %cst_138 : f32 to vector<8x8xf32>
    %212 = arith.mulf %210, %211 : vector<8x8xf32>
    %c0_139 = arith.constant 0 : index
    %c32 = arith.constant 32 : index
    %c0_140 = arith.constant 0 : index
    %213 = vector.load %arg5[%c0_139, %c32, %c0_140] : memref<1x64x8xf32, #tpu.memory_space<vmem>>, vector<1x8x8xf32>
    %214 = vector.shape_cast %213 : vector<1x8x8xf32> to vector<8x8xf32>
    %215 = vector.shape_cast %212 : vector<8x8xf32> to vector<1x8x8xf32>
    tpu.vector_store %arg5[%c0_139, %c32, %c0_140], %215 {strides = array<i32>} : memref<1x64x8xf32, #tpu.memory_space<vmem>>, vector<1x8x8xf32>,
    %c0_141 = arith.constant 0 : index
    %c8_142 = arith.constant 8 : index
    %c0_143 = arith.constant 0 : index
    %c0_144 = arith.constant 0 : index
    %216 = vector.load %arg2[%c0_141, %c8_142, %c0_143, %c0_144] : memref<1x32x8x16xf32, #tpu.memory_space<vmem>>, vector<1x8x8x16xf32>
    %217 = vector.shape_cast %216 : vector<1x8x8x16xf32> to vector<8x8x16xf32>
    %cst_145 = arith.constant dense<0xFF800000> : vector<8x8xf32>
    %218 = vector.multi_reduction <maximumf>, %217, %cst_145 [2] : vector<8x8x16xf32> to vector<8x8xf32>
    %c0_146 = arith.constant 0 : index
    %c8_147 = arith.constant 8 : index
    %c0_148 = arith.constant 0 : index
    %219 = vector.load %arg5[%c0_146, %c8_147, %c0_148] : memref<1x64x8xf32, #tpu.memory_space<vmem>>, vector<1x8x8xf32>
    %220 = vector.shape_cast %219 : vector<1x8x8xf32> to vector<8x8xf32>
    %221 = vector.shape_cast %218 : vector<8x8xf32> to vector<1x8x8xf32>
    tpu.vector_store %arg5[%c0_146, %c8_147, %c0_148], %221 {strides = array<i32>} : memref<1x64x8xf32, #tpu.memory_space<vmem>>, vector<1x8x8xf32>,
    %222 = vector.shape_cast %200 : vector<8x16xf32> to vector<1x8x16xf32>
    %223 = vector.broadcast %222 : vector<1x8x16xf32> to vector<8x8x16xf32>
    %224 = arith.mulf %217, %223 : vector<8x8x16xf32>
    %cst_149 = arith.constant dense<0.000000e+00> : vector<8x8xf32>
    %225 = vector.multi_reduction <add>, %224, %cst_149 [2] : vector<8x8x16xf32> to vector<8x8xf32>
    %cst_150 = arith.constant 2.500000e-01 : f32
    %226 = vector.broadcast %cst_150 : f32 to vector<8x8xf32>
    %227 = arith.mulf %225, %226 : vector<8x8xf32>
    %c0_151 = arith.constant 0 : index
    %c40 = arith.constant 40 : index
    %c0_152 = arith.constant 0 : index
    %228 = vector.load %arg5[%c0_151, %c40, %c0_152] : memref<1x64x8xf32, #tpu.memory_space<vmem>>, vector<1x8x8xf32>
    %229 = vector.shape_cast %228 : vector<1x8x8xf32> to vector<8x8xf32>
    %230 = vector.shape_cast %227 : vector<8x8xf32> to vector<1x8x8xf32>
    tpu.vector_store %arg5[%c0_151, %c40, %c0_152], %230 {strides = array<i32>} : memref<1x64x8xf32, #tpu.memory_space<vmem>>, vector<1x8x8xf32>,
    %c0_153 = arith.constant 0 : index
    %c16_154 = arith.constant 16 : index
    %c0_155 = arith.constant 0 : index
    %c0_156 = arith.constant 0 : index
    %231 = vector.load %arg2[%c0_153, %c16_154, %c0_155, %c0_156] : memref<1x32x8x16xf32, #tpu.memory_space<vmem>>, vector<1x8x8x16xf32>
    %232 = vector.shape_cast %231 : vector<1x8x8x16xf32> to vector<8x8x16xf32>
    %cst_157 = arith.constant dense<0xFF800000> : vector<8x8xf32>
    %233 = vector.multi_reduction <maximumf>, %232, %cst_157 [2] : vector<8x8x16xf32> to vector<8x8xf32>
    %c0_158 = arith.constant 0 : index
    %c16_159 = arith.constant 16 : index
    %c0_160 = arith.constant 0 : index
    %234 = vector.load %arg5[%c0_158, %c16_159, %c0_160] : memref<1x64x8xf32, #tpu.memory_space<vmem>>, vector<1x8x8xf32>
    %235 = vector.shape_cast %234 : vector<1x8x8xf32> to vector<8x8xf32>
    %236 = vector.shape_cast %233 : vector<8x8xf32> to vector<1x8x8xf32>
    tpu.vector_store %arg5[%c0_158, %c16_159, %c0_160], %236 {strides = array<i32>} : memref<1x64x8xf32, #tpu.memory_space<vmem>>, vector<1x8x8xf32>,
    %237 = vector.shape_cast %200 : vector<8x16xf32> to vector<1x8x16xf32>
    %238 = vector.broadcast %237 : vector<1x8x16xf32> to vector<8x8x16xf32>
    %239 = arith.mulf %232, %238 : vector<8x8x16xf32>
    %cst_161 = arith.constant dense<0.000000e+00> : vector<8x8xf32>
    %240 = vector.multi_reduction <add>, %239, %cst_161 [2] : vector<8x8x16xf32> to vector<8x8xf32>
    %cst_162 = arith.constant 2.500000e-01 : f32
    %241 = vector.broadcast %cst_162 : f32 to vector<8x8xf32>
    %242 = arith.mulf %240, %241 : vector<8x8xf32>
    %c0_163 = arith.constant 0 : index
    %c48 = arith.constant 48 : index
    %c0_164 = arith.constant 0 : index
    %243 = vector.load %arg5[%c0_163, %c48, %c0_164] : memref<1x64x8xf32, #tpu.memory_space<vmem>>, vector<1x8x8xf32>
    %244 = vector.shape_cast %243 : vector<1x8x8xf32> to vector<8x8xf32>
    %245 = vector.shape_cast %242 : vector<8x8xf32> to vector<1x8x8xf32>
    tpu.vector_store %arg5[%c0_163, %c48, %c0_164], %245 {strides = array<i32>} : memref<1x64x8xf32, #tpu.memory_space<vmem>>, vector<1x8x8xf32>,
    %c0_165 = arith.constant 0 : index
    %c24_166 = arith.constant 24 : index
    %c0_167 = arith.constant 0 : index
    %c0_168 = arith.constant 0 : index
    %246 = vector.load %arg2[%c0_165, %c24_166, %c0_167, %c0_168] : memref<1x32x8x16xf32, #tpu.memory_space<vmem>>, vector<1x8x8x16xf32>
    %247 = vector.shape_cast %246 : vector<1x8x8x16xf32> to vector<8x8x16xf32>
    %cst_169 = arith.constant dense<0xFF800000> : vector<8x8xf32>
    %248 = vector.multi_reduction <maximumf>, %247, %cst_169 [2] : vector<8x8x16xf32> to vector<8x8xf32>
    %c0_170 = arith.constant 0 : index
    %c24_171 = arith.constant 24 : index
    %c0_172 = arith.constant 0 : index
    %249 = vector.load %arg5[%c0_170, %c24_171, %c0_172] : memref<1x64x8xf32, #tpu.memory_space<vmem>>, vector<1x8x8xf32>
    %250 = vector.shape_cast %249 : vector<1x8x8xf32> to vector<8x8xf32>
    %251 = vector.shape_cast %248 : vector<8x8xf32> to vector<1x8x8xf32>
    tpu.vector_store %arg5[%c0_170, %c24_171, %c0_172], %251 {strides = array<i32>} : memref<1x64x8xf32, #tpu.memory_space<vmem>>, vector<1x8x8xf32>,
    %252 = vector.shape_cast %200 : vector<8x16xf32> to vector<1x8x16xf32>
    %253 = vector.broadcast %252 : vector<1x8x16xf32> to vector<8x8x16xf32>
    %254 = arith.mulf %247, %253 : vector<8x8x16xf32>
    %cst_173 = arith.constant dense<0.000000e+00> : vector<8x8xf32>
    %255 = vector.multi_reduction <add>, %254, %cst_173 [2] : vector<8x8x16xf32> to vector<8x8xf32>
    %cst_174 = arith.constant 2.500000e-01 : f32
    %256 = vector.broadcast %cst_174 : f32 to vector<8x8xf32>
    %257 = arith.mulf %255, %256 : vector<8x8xf32>
    %c0_175 = arith.constant 0 : index
    %c56 = arith.constant 56 : index
    %c0_176 = arith.constant 0 : index
    %258 = vector.load %arg5[%c0_175, %c56, %c0_176] : memref<1x64x8xf32, #tpu.memory_space<vmem>>, vector<1x8x8xf32>
    %259 = vector.shape_cast %258 : vector<1x8x8xf32> to vector<8x8xf32>
    %260 = vector.shape_cast %257 : vector<8x8xf32> to vector<1x8x8xf32>
    tpu.vector_store %arg5[%c0_175, %c56, %c0_176], %260 {strides = array<i32>} : memref<1x64x8xf32, #tpu.memory_space<vmem>>, vector<1x8x8xf32>,
    return
  }
  func.func @transform_0(%arg0: i32, %arg1: i32) -> (i32, i32, i32, i32) {
    %c0_i32 = arith.constant 0 : i32
    %c0_i32_0 = arith.constant 0 : i32
    %c0_i32_1 = arith.constant 0 : i32
    return %arg0, %c0_i32, %arg1, %c0_i32_0 : i32, i32, i32, i32
  }
  func.func @transform_1(%arg0: i32, %arg1: i32) -> i32 {
    %c0_i32 = arith.constant 0 : i32
    %c0_i32_0 = arith.constant 0 : i32
    return %c0_i32 : i32
  }
  func.func @transform_2(%arg0: i32, %arg1: i32) -> i32 {
    %c0_i32 = arith.constant 0 : i32
    %c0_i32_0 = arith.constant 0 : i32
    return %c0_i32 : i32
  }
  func.func @transform_3(%arg0: i32, %arg1: i32) -> (i32, i32, i32) {
    %c0_i32 = arith.constant 0 : i32
    %c0_i32_0 = arith.constant 0 : i32
    return %arg0, %c0_i32, %arg1 : i32, i32, i32
  }
}

</mosaic_0001>

<bundles_post_ra>
// kernel: tpu_custom_call.1
= control target key start
LH: loop header
LB: loop body
LE: loop exit
PB: predicated region body
PF: predicated region fallthrough
CT: control target
= control target key end

     0   :  { %s1803_s0 = inlined_call_operand.vmem [shape: f32[2,32,8,16], index: 0, kind: input, shape index: {}]   ;;  %s1804_s1 = inlined_call_operand.vmem [shape: f32[32], index: 1, kind: input, shape index: {}]   ;;  %s1805_s2 = inlined_call_operand.<no memory space> [shape: f32[1], index: 2, kind: input, shape index: {}]   ;;  %s1806_s3 = inlined_call_operand.vmem [shape: f32[2,64,8], index: 3, kind: output, shape index: {}]  }
   0x1   :  { %8 = sst [smem:[#allocation2]] %s1805_s2 }
   0x2   :  { %9 = vsyncpa [#allocation4], 0  ;;  %s1235_s14 = smov 0   ;;  %s1237_s15 = smov 0  }
   0x3   :  { %s1239_s16 = smov 0  }
   0x4 LB: > { %s1026_s2 = sadd.s32 4294967295, %s1209_s16   ;;  %s27_s17 = sadd.s32 1, %s1205_s15  ;;  %s1209_s16 = sphi %s1239_s16, %s15_s16   ;;  %s1205_s15 = sphi %s1237_s15, %s1808_s15   ;;  %s1201_s14 = sphi %s1235_s14, %s1807_s14  }
   0x5   : > { %p29_p0 = scmp.ge.s32.totalorder %s27_s17, 2  ;;  %p1028_p1 = scmp.ge.s32.totalorder %s1209_s16, 1 }
   0x6   : > { %p130_p2 = scmp.lt.s32.totalorder %s1209_s16, 3  ;;  %p1135_p4 = scmp.eq.s32.totalorder %s1026_s2, 0 }
   0x7   : > { %s1810_s17 = smov (%p29_p0, %s27_s17), 0  ;;  %s142_s20 = sshll.u32 %s1804_s1, 4  ;;  %s143_s20 = int_to_ptr.vmem [resolvable:$true] %s142_s20 }
   0x8   : > { %p131_p3 = pnand %p1028_p1, %p130_p2  ;;  %s1211_s21 = smov [#allocation3]  }
   0xa   : > { %p1131_p5 = pneg %p131_p3  ;;  %169 = sbr.rel (%p131_p3) target bundleno = 431 (0x1af), region = 32 }
   0xc   : > { %p1132_p6 = pnand %p1135_p4, %p1131_p5 }
   0xe   : > { %1134 = dma.vmem_to_smem (!%p1132_p6), %s143_s20, 16, %s1211_s21, [#allocation4]  }
   0xf   : > { %1196 = dma.done.wait (%p1135_p4), [#allocation4], 16  }
  0x10   : > { %1198 = vsyncadd (%p1135_p4), [#allocation4], 4294967280 }
  0x11   : > { %176 = sfence }
  0x12   : > { %p201_p7 = scmp.lt.s32.totalorder %s1201_s14, 1  ;;  %s1257_s22 = sld [smem:[#allocation3]]  ;;  %vm413_vm0 = vcmask 130048   ;;  %vm482_vm1 = vcmask 1041409   ;;  %vm484_vm2 = vcmask 1042434   ;;  %vm486_vm3 = vcmask 1043459  }
  0x13   : > { %s1259_s23 = sld [smem:[#allocation3 + $0x1]]  ;;  %vm488_vm4 = vcmask 1044484   ;;  %vm490_vm5 = vcmask 1045509   ;;  %vm492_vm6 = vcmask 1046534   ;;  %vm494_vm7 = vcmask 1047559  }
  0x14   : > { %s1812_s14 = smov (!%p201_p7, %s1201_s14), 1  ;;  %s1263_s24 = sld [smem:[#allocation3 + $0x2]]  ;;  %vm497_vm8 = vcmask 64512  }
  0x15   : > { %s1125_s25 = sshll.u32 %s1812_s14, 8  ;;  %s1266_s26 = sld [smem:[#allocation3 + $0x3]] }
  0x16   : > { %s1271_s29 = scalar_lea.vmem %s1803_s0, %s1125_s25  ;;  %s1044_s30 = sld [smem:[#allocation3 + $0x4]] }
  0x17   : > { %v1274_v0 = vld [vmem:[%s1271_s29 + $0x18] sm:$0xff]  ;;  %v1277_v1 = vld [vmem:[%s1271_s29 + $0x8] sm:$0xff]  ;;  %v1280_v2 = vld [vmem:[%s1271_s29] sm:$0xff]  ;;  %s1046_s4 = sld [smem:[#allocation3 + $0x5]] }
  0x18   : > { %v449_v3 = vsel %vm413_vm0, %v1274_v0, -inf  ;;  %v443_v4 = vsel %vm413_vm0, %v1277_v1, -inf  ;;  %v440_v5 = vsel %vm413_vm0, %v1280_v2, -inf  ;;  %v1289_v6 = vld [vmem:[%s1271_s29 + $0x20] sm:$0xff]  ;;  %v1292_v7 = vld [vmem:[%s1271_s29 + $0x10] sm:$0xff]  ;;  %v219_v8 = vstv %s1257_s22  ;;  %s1295_s5 = sld [smem:[#allocation3 + $0x6]] }
  0x19   : > { %450 = vmax.xlane.f32.xlu2 %v449_v3  ;;  %444 = vmax.xlane.f32.xlu1 %v443_v4  ;;  %v1298_v9 = vld [vmem:[%s1271_s29 + $0x28] sm:$0xff]  ;;  %v224_v10 = vstv %s1259_s23  ;;  %s1301_s6 = sld [smem:[#allocation3 + $0x7]]  ;;  %v452_v13 = vsel %vm413_vm0, %v1289_v6, -inf  ;;  %v446_v14 = vsel %vm413_vm0, %v1292_v7, -inf  ;;  %v220_v17 = vmul.f32 %v1280_v2, %v219_v8  ;;  %v1318_v20 = vld [vmem:[%s1271_s29 + $0x30] sm:$0xff]  ;;  %v1325_v23 = vld [vmem:[%s1271_s29 + $0x38] sm:$0xff] }
  0x1a   : > { %441 = vmax.xlane.f32.xlu0 %v440_v5  ;;  %v229_v15 = vstv %s1263_s24  ;;  %s1308_s7 = sld [smem:[#allocation3 + $0x8]]  ;;  %v455_v16 = vsel %vm413_vm0, %v1298_v9, -inf  ;;  %v225_v21 = vmul.f32 %v1277_v1, %v224_v10  ;;  %v1331_v25 = vld [vmem:[%s1271_s29 + $0x40] sm:$0xff]  ;;  %v1338_v28 = vld [vmem:[%s1271_s29 + $0x48] sm:$0xff]  ;;  %v1345_v32 = vld [vmem:[%s1271_s29 + $0x50] sm:$0xff]  ;;  %v461_v36 = vsel %vm413_vm0, %v1325_v23, -inf }
  0x1b   : > { %v234_v18 = vstv %s1266_s26  ;;  %s1315_s8 = sld [smem:[#allocation3 + $0x9]]  ;;  %v230_v24 = vmul.f32 %v1292_v7, %v229_v15  ;;  %v1354_v37 = vld [vmem:[%s1271_s29 + $0x58] sm:$0xff]  ;;  %v458_v41 = vsel %vm413_vm0, %v1318_v20, -inf  ;;  %v1363_v42 = vld [vmem:[%s1271_s29 + $0x60] sm:$0xff]  ;;  %v575_v46 = vsel %vm413_vm0, %v1338_v28, -inf  ;;  %v1372_v47 = vld [vmem:[%s1271_s29 + $0x68] sm:$0xff] }
  0x1c   : > { %v239_v11 = vstv %s1044_s30  ;;  %s1322_s9 = sld [smem:[#allocation3 + $0xa]]  ;;  %v235_v26 = vmul.f32 %v1274_v0, %v234_v18  ;;  %v1379_v51 = vld [vmem:[%s1271_s29 + $0x70] sm:$0xff]  ;;  %v1386_v55 = vld [vmem:[%s1271_s29 + $0x78] sm:$0xff]  ;;  %v1395_v62 = vld [vmem:[%s1271_s29 + $0x80] sm:$0xff]  ;;  %v578_v18 = vsel %vm413_vm0, %v1345_v32, -inf }
  0x1d   : > { %v245_v12 = vstv %s1046_s4  ;;  %v240_v19 = vmul.f32 %v1289_v6, %v239_v11  ;;  %s1328_s10 = sld [smem:[#allocation3 + $0xb]]  ;;  %v1402_v5 = vld [vmem:[%s1271_s29 + $0x88] sm:$0xff] }
  0x1e   : > { %v246_v22 = vmul.f32 %v1298_v9, %v245_v12  ;;  %v251_v27 = vstv %s1295_s5  ;;  %s1335_s11 = sld [smem:[#allocation3 + $0xc]]  ;;  %v1409_v12 = vld [vmem:[%s1271_s29 + $0x90] sm:$0xff] }
  0x1f   : > { %v241_v29 = vadd.f32 %v240_v19, %v220_v17  ;;  %v252_v30 = vmul.f32 %v1318_v20, %v251_v27  ;;  %v257_v31 = vstv %s1301_s6  ;;  %s1342_s12 = sld [smem:[#allocation3 + $0xd]]  ;;  %v1418_v17 = vld [vmem:[%s1271_s29 + $0x98] sm:$0xff] }
  0x20   : > { %v247_v33 = vadd.f32 %v246_v22, %v225_v21  ;;  %v258_v34 = vmul.f32 %v1325_v23, %v257_v31  ;;  %v263_v35 = vstv %s1308_s7  ;;  %s1349_s13 = sld [smem:[#allocation3 + $0xe]]  ;;  %v1436_v31 = vld [vmem:[%s1271_s29 + $0xa8] sm:$0xff] }
  0x21   : > { %453 = vmax.xlane.f32.xlu2 %v452_v13  ;;  %447 = vmax.xlane.f32.xlu1 %v446_v14  ;;  %v253_v38 = vadd.f32 %v252_v30, %v230_v24  ;;  %v264_v39 = vmul.f32 %v1331_v25, %v263_v35  ;;  %v269_v40 = vstv %s1315_s8  ;;  %s1358_s2 = sld [smem:[#allocation3 + $0xf]]  ;;  %v572_v13 = vsel %vm413_vm0, %v1331_v25, -inf  ;;  %v1427_v24 = vld [vmem:[%s1271_s29 + $0xa0] sm:$0xff] }
  0x22   : > { %456 = vmax.xlane.f32.xlu0 %v455_v16  ;;  %v259_v43 = vadd.f32 %v258_v34, %v235_v26  ;;  %v270_v44 = vmul.f32 %v1338_v28, %v269_v40  ;;  %v275_v45 = vstv %s1322_s9  ;;  %s1367_s18 = sld [smem:[#allocation3 + $0x10]]  ;;  %v584_v26 = vsel %vm413_vm0, %v1363_v42, -inf }
  0x23   : > { %v265_v48 = vadd.f32 %v264_v39, %v241_v29  ;;  %v276_v49 = vmul.f32 %v1345_v32, %v275_v45  ;;  %v281_v50 = vstv %s1328_s10  ;;  %s1376_s19 = sld [smem:[#allocation3 + $0x11]] }
  0x24   : > { %v271_v52 = vadd.f32 %v270_v44, %v247_v33  ;;  %v282_v53 = vmul.f32 %v1354_v37, %v281_v50  ;;  %v287_v54 = vstv %s1335_s11  ;;  %s1383_s20 = sld [smem:[#allocation3 + $0x12]] }
  0x25   : > { %v277_v56 = vadd.f32 %v276_v49, %v253_v38  ;;  %v288_v57 = vmul.f32 %v1363_v42, %v287_v54  ;;  %v293_v58 = vstv %s1342_s12  ;;  %s1390_s21 = sld [smem:[#allocation3 + $0x13]] }
  0x26   : > { %v283_v59 = vadd.f32 %v282_v53, %v259_v43  ;;  %v294_v60 = vmul.f32 %v1372_v47, %v293_v58  ;;  %v299_v61 = vstv %s1349_s13  ;;  %s1397_s22 = sld [smem:[#allocation3 + $0x14]]  ;;  %v581_v58 = vsel %vm413_vm0, %v1354_v37, -inf }
  0x27   : > { %v289_v63 = vadd.f32 %v288_v57, %v265_v48  ;;  %v300_v3 = vmul.f32 %v1379_v51, %v299_v61  ;;  %v305_v4 = vstv %s1358_s2  ;;  %s1404_s23 = sld [smem:[#allocation3 + $0x15]]  ;;  %v1471_v57 = vld [vmem:[%s1271_s29 + $0xd0] sm:$0xff] }
  0x28   : > { %v295_v8 = vadd.f32 %v294_v60, %v271_v52  ;;  %v306_v10 = vmul.f32 %v1386_v55, %v305_v4  ;;  %v311_v11 = vstv %s1367_s18  ;;  %s1411_s24 = sld [smem:[#allocation3 + $0x16]]  ;;  %v1464_v52 = vld [vmem:[%s1271_s29 + $0xc8] sm:$0xff] }
  0x29   : > { %462 = vmax.xlane.f32.xlu2 %v461_v36  ;;  %459 = vmax.xlane.f32.xlu1 %v458_v41  ;;  %v301_v14 = vadd.f32 %v300_v3, %v277_v56  ;;  %v312_v15 = vmul.f32 %v1395_v62, %v311_v11  ;;  %v317_v16 = vstv %s1376_s19  ;;  %s1420_s25 = sld [smem:[#allocation3 + $0x17]]  ;;  %v1443_v36 = vld [vmem:[%s1271_s29 + $0xb0] sm:$0xff]  ;;  %v1450_v41 = vld [vmem:[%s1271_s29 + $0xb8] sm:$0xff]  ;;  %v587_v3 = vsel %vm413_vm0, %v1372_v47, -inf  ;;  %v1487_v11 = vld [vmem:[%s1271_s29 + $0xe0] sm:$0xff] }
  0x2a   : > { %576 = vmax.xlane.f32.xlu0 %v575_v46  ;;  %v307_v19 = vadd.f32 %v306_v10, %v283_v59  ;;  %v318_v21 = vmul.f32 %v1402_v5, %v317_v16  ;;  %v323_v22 = vstv %s1383_s20  ;;  %s1429_s26 = sld [smem:[#allocation3 + $0x18]]  ;;  %v1457_v46 = vld [vmem:[%s1271_s29 + $0xc0] sm:$0xff] }
  0x2b   : > { %v313_v27 = vadd.f32 %v312_v15, %v289_v63  ;;  %v324_v29 = vmul.f32 %v1409_v12, %v323_v22  ;;  %v329_v30 = vstv %s1390_s21  ;;  %s1438_s27 = sld [smem:[#allocation3 + $0x19]]  ;;  %v1480_v63 = vld [vmem:[%s1271_s29 + $0xd8] sm:$0xff] }
  0x2c   : > { %v319_v33 = vadd.f32 %v318_v21, %v295_v8  ;;  %v330_v34 = vmul.f32 %v1418_v17, %v329_v30  ;;  %v335_v35 = vstv %s1397_s22  ;;  %s1445_s28 = sld [smem:[#allocation3 + $0x1a]] }
  0x2d   : > { %v325_v38 = vadd.f32 %v324_v29, %v301_v14  ;;  %v336_v39 = vmul.f32 %v1427_v24, %v335_v35  ;;  %v341_v40 = vstv %s1404_s23  ;;  %s1452_s30 = sld [smem:[#allocation3 + $0x1b]] }
  0x2e   : > { %v331_v43 = vadd.f32 %v330_v34, %v307_v19  ;;  %v342_v44 = vmul.f32 %v1436_v31, %v341_v40  ;;  %v347_v45 = vstv %s1411_s24  ;;  %s1459_s4 = sld [smem:[#allocation3 + $0x1c]] }
  0x2f   : > { %v337_v48 = vadd.f32 %v336_v39, %v313_v27  ;;  %v348_v49 = vmul.f32 %v1443_v36, %v347_v45  ;;  %v353_v50 = vstv %s1420_s25  ;;  %s1466_s5 = sld [smem:[#allocation3 + $0x1d]] }
  0x30   : > { %v343_v53 = vadd.f32 %v342_v44, %v319_v33  ;;  %v354_v54 = vmul.f32 %v1450_v41, %v353_v50  ;;  %v359_v56 = vstv %s1429_s26  ;;  %s1473_s6 = sld [smem:[#allocation3 + $0x1e]]  ;;  %v1504_v33 = vld [vmem:[%s1271_s29 + $0xf8] sm:$0xff] }
  0x31   : > { %573 = vmax.xlane.f32.xlu2 %v572_v13  ;;  %579 = vmax.xlane.f32.xlu1 %v578_v18  ;;  %v349_v59 = vadd.f32 %v348_v49, %v325_v38  ;;  %v360_v60 = vmul.f32 %v1457_v46, %v359_v56  ;;  %v365_v61 = vstv %s1438_s27  ;;  %s1098_s7 = sld [smem:[#allocation3 + $0x1f]]  ;;  %v593_v13 = vsel %vm413_vm0, %v1386_v55, -inf  ;;  %v1494_v18 = vld [vmem:[%s1271_s29 + $0xe8] sm:$0xff] }
  0x32   : > { %585 = vmax.xlane.f32.xlu0 %v584_v26  ;;  %v355_v4 = vadd.f32 %v354_v54, %v331_v43  ;;  %v366_v8 = vmul.f32 %v1464_v52, %v365_v61  ;;  %v371_v10 = vstv %s1445_s28  ;;  %v1499_v26 = vld [vmem:[%s1271_s29 + $0xf0] sm:$0xff]  ;;  %s407_s8 = sld [smem:[#allocation2]]  ;;  %v590_v49 = vsel %vm413_vm0, %v1379_v51, -inf  ;;  %s1126_s29 = sshll.u32 %s1812_s14, 6 }
  0x33   : > { %v361_v14 = vadd.f32 %v360_v60, %v337_v48  ;;  %v372_v15 = vmul.f32 %v1471_v57, %v371_v10  ;;  %v377_v16 = vstv %s1452_s30  ;;  %v694_v10 = vsel %vm413_vm0, %v1395_v62, -inf  ;;  %s1553_s11 = scalar_lea.vmem %s1806_s3, %s1126_s29 }
  0x34   : > { %v367_v19 = vadd.f32 %v366_v8, %v343_v53  ;;  %v378_v21 = vmul.f32 %v1480_v63, %v377_v16  ;;  %v383_v22 = vstv %s1459_s4  ;;  %v697_v8 = vsel %vm413_vm0, %v1402_v5, -inf }
  0x35   : > { %v373_v27 = vadd.f32 %v372_v15, %v349_v59  ;;  %v384_v29 = vmul.f32 %v1487_v11, %v383_v22  ;;  %v389_v30 = vstv %s1466_s5  ;;  %v703_v15 = vsel %vm413_vm0, %v1418_v17, -inf }
  0x36   : > { %v379_v34 = vadd.f32 %v378_v21, %v355_v4  ;;  %v390_v35 = vmul.f32 %v1494_v18, %v389_v30  ;;  %v395_v38 = vstv %s1473_s6  ;;  %v709_v16 = vsel %vm413_vm0, %v1436_v31, -inf }
  0x37   : > { %v385_v39 = vadd.f32 %v384_v29, %v361_v14  ;;  %v396_v40 = vmul.f32 %v1499_v26, %v395_v38  ;;  %v401_v43 = vstv %s1098_s7  ;;  %v706_v14 = vsel %vm413_vm0, %v1427_v24, -inf }
  0x38   : > { %v391_v44 = vadd.f32 %v390_v35, %v367_v19  ;;  %v402_v45 = vmul.f32 %v1504_v33, %v401_v43  ;;  %v408_v56 = vstv %s407_s8  ;;  %v715_v19 = vsel %vm413_vm0, %v1450_v41, -inf }
  0x39   : > { %582 = vmax.xlane.f32.xlu2 %v581_v58  ;;  %588 = vmax.xlane.f32.xlu1 %v587_v3  ;;  %v397_v48 = vadd.f32 %v396_v40, %v373_v27  ;;  %v712_v21 = vsel %vm413_vm0, %v1443_v36, -inf  ;;  %v472_v22 = vlaneseq  ;;  %v819_v35 = vsel %vm413_vm0, %v1464_v52, -inf }
  0x3a   : > { %594 = vmax.xlane.f32.xlu0 %v593_v13  ;;  %v403_v50 = vadd.f32 %v402_v45, %v379_v34  ;;  %v404_v53 = vadd.f32 %v391_v44, %v385_v39  ;;  %v700_v13 = vsel %vm413_vm0, %v1409_v12, -inf }
  0x3b   : > { %v1532_v34 = vand.u32 127, %v472_v22 }
  0x3c   : > { %v405_v54 = vadd.f32 %v403_v50, %v397_v48 }
  0x3e   : > { %v406_v58 = vadd.f32 %v405_v54, %v404_v53 }
  0x40   : > { %v409_v59 = vadd.f32 %v408_v56, %v406_v58 }
  0x41   : > { %591 = vmax.xlane.f32.xlu2 %v590_v49  ;;  %698 = vmax.xlane.f32.xlu1 %v697_v8 }
  0x42   : > { %1162 = vtanh.f32 %v409_v59 }
  0x48   : > { %v1163_v60 = vpop.eup %1162 }
  0x49   : > { %v411_v61 = vmul.f32 1.442695, %v1163_v60  ;;  %701 = vmax.xlane.f32.xlu2 %v700_v13  ;;  %707 = vmax.xlane.f32.xlu1 %v706_v14 }
  0x4b   : > { %1164 = vpow2.f32 %v411_v61 }
  0x51   : > { %v1512_v3 = vpop.eup %1164  ;;  %710 = vmax.xlane.f32.xlu2 %v709_v16  ;;  %716 = vmax.xlane.f32.xlu1 %v715_v19 }
  0x52   : > { %v414_v4 = vsel %vm413_vm0, %v1512_v3, 0.0 }
  0x53   : > { %415 = vadd.xlane.f32.xlu0 %v414_v4 }
  0x59   : > { %820 = vmax.xlane.f32.xlu1 %v819_v35 }
  0x5b   : > { %695 = vmax.xlane.f32.xlu0 %v694_v10 }
  0x63   : > { %704 = vmax.xlane.f32.xlu0 %v703_v15 }
  0x6b   : > { %713 = vmax.xlane.f32.xlu0 %v712_v21 }
  0x8c   : > { %v451_v27 = vpop.xlane.xlu2 %450  ;;  %v445_v29 = vpop.xlane.xlu1 %444 }
  0x8d   : > { %v442_v30 = vpop.xlane.xlu0 %441  ;;  %v475_v38 = vperm.slane %v445_v29, %v1532_v34  ;;  %v477_v40 = vperm.slane %v451_v27, %v1532_v34  ;;  %v816_v29 = vsel %vm413_vm0, %v1457_v46, -inf }
  0x8e   : > { %v474_v39 = vperm.slane %v442_v30, %v1532_v34  ;;  %817 = vmax.xlane.f32.xlu0 %v816_v29 }
  0x90   : > { %v483_v49 = vsel %vm482_vm1, %v475_v38, %v474_v39  ;;  %v828_v39 = vsel %vm413_vm0, %v1487_v11, -inf }
  0x91   : > { %829 = vmax.xlane.f32.xlu1 %v828_v39 }
  0x94   : > { %v454_v43 = vpop.xlane.xlu2 %453  ;;  %v448_v44 = vpop.xlane.xlu1 %447 }
  0x95   : > { %v476_v45 = vperm.slane %v448_v44, %v1532_v34  ;;  %v457_v48 = vpop.xlane.xlu0 %456  ;;  %v478_v50 = vperm.slane %v454_v43, %v1532_v34 }
  0x96   : > { %v479_v58 = vperm.slane %v457_v48, %v1532_v34 }
  0x97   : > { %v485_v53 = vsel %vm484_vm2, %v476_v45, %v483_v49 }
  0x98   : > { %v487_v54 = vsel %vm486_vm3, %v477_v40, %v485_v53  ;;  %v822_v53 = vsel %vm413_vm0, %v1471_v57, -inf }
  0x99   : > { %v489_v56 = vsel %vm488_vm4, %v478_v50, %v487_v54  ;;  %823 = vmax.xlane.f32.xlu0 %v822_v53 }
  0x9a   : > { %v491_v8 = vsel %vm490_vm5, %v479_v58, %v489_v56  ;;  %v825_v56 = vsel %vm413_vm0, %v1480_v63, -inf }
  0x9b   : > { %826 = vmax.xlane.f32.xlu2 %v825_v56 }
  0x9c   : > { %v463_v59 = vpop.xlane.xlu2 %462  ;;  %v460_v60 = vpop.xlane.xlu1 %459 }
  0x9d   : > { %v481_v61 = vperm.slane %v463_v59, %v1532_v34  ;;  %v480_v4 = vperm.slane %v460_v60, %v1532_v34  ;;  %v577_v13 = vpop.xlane.xlu0 %576 }
  0x9e   : > { %v605_v22 = vperm.slane %v577_v13, %v1532_v34 }
  0x9f   : > { %v493_v10 = vsel %vm492_vm6, %v480_v4, %v491_v8 }
  0xa0   : > { %v495_v14 = vsel %vm494_vm7, %v481_v61, %v493_v10  ;;  %v831_v61 = vsel %vm413_vm0, %v1494_v18, -inf }
  0xa1   : > { %498 = vst.msk [vmem:[%s1553_s11] sm:$0xff] %vm497_vm8, %v495_v14  ;;  %832 = vmax.xlane.f32.xlu1 %v831_v61 }
  0xa4   : > { %v574_v15 = vpop.xlane.xlu2 %573  ;;  %v580_v16 = vpop.xlane.xlu1 %579 }
  0xa5   : > { %v604_v19 = vperm.slane %v574_v15, %v1532_v34  ;;  %v586_v21 = vpop.xlane.xlu0 %585  ;;  %v606_v27 = vperm.slane %v580_v16, %v1532_v34 }
  0xa6   : > { %v608_v45 = vperm.slane %v586_v21, %v1532_v34 }
  0xa7   : > { %v612_v30 = vsel %vm482_vm1, %v605_v22, %v604_v19 }
  0xa8   : > { %v613_v40 = vsel %vm484_vm2, %v606_v27, %v612_v30 }
  0xac   : > { %v583_v35 = vpop.xlane.xlu2 %582  ;;  %v589_v43 = vpop.xlane.xlu1 %588 }
  0xad   : > { %v607_v38 = vperm.slane %v583_v35, %v1532_v34  ;;  %v609_v48 = vperm.slane %v589_v43, %v1532_v34  ;;  %v595_v49 = vpop.xlane.xlu0 %594 }
  0xae   : > { %v611_v59 = vperm.slane %v595_v49, %v1532_v34 }
  0xaf   : > { %v614_v44 = vsel %vm486_vm3, %v607_v38, %v613_v40 }
  0xb0   : > { %v615_v50 = vsel %vm488_vm4, %v608_v45, %v614_v44 }
  0xb1   : > { %v616_v60 = vsel %vm490_vm5, %v609_v48, %v615_v50 }
  0xb4   : > { %v592_v54 = vpop.xlane.xlu2 %591 }
  0xb5   : > { %v610_v58 = vperm.slane %v592_v54, %v1532_v34 }
  0xb7   : > { %v617_v4 = vsel %vm492_vm6, %v610_v58, %v616_v60 }
  0xb8   : > { %v618_v8 = vsel %vm494_vm7, %v611_v59, %v617_v4 }
  0xb9   : > { %620 = vst.msk [vmem:[%s1553_s11 + $0x8] sm:$0xff] %vm497_vm8, %v618_v8  ;;  %v699_v8 = vpop.xlane.xlu1 %698 }
  0xc6   : > { %v416_v10 = vpop.xlane.xlu0 %415 }
  0xc7   : > { %1166 = vrcp.f32 %v416_v10  ;;  %v428_v16 = vand.u32 2147483648, %v416_v10  ;;  %v426_v21 = vand.u32 2147483647, %v416_v10  ;;  %vm422_vm10 = vweird.f32 %v416_v10 }
  0xc9   : > { %v429_v27 = vor.u32 1.1754944e-38, %v428_v16  ;;  %vm427_vm12 = vcmp.eq.f32.partialorder %v426_v21, 8.507059e+37  ;;  %v702_v21 = vpop.xlane.xlu2 %701 }
  0xcd   : > { %v1167_v13 = vpop.eup %1166 }
  0xce   : > { %v418_v14 = vmul.f32 %v1167_v13, %v416_v10  ;;  %vm423_vm9 = vweird.f32 %v1167_v13  ;;  %v696_v10 = vpop.xlane.xlu0 %695 }
  0xcf   : > { %vm424_vm11 = vmor %vm422_vm10, %vm423_vm9 }
  0xd0   : > { %v419_v15 = vsub.f32 1.0, %v418_v14  ;;  %v726_v14 = vperm.slane %v696_v10, %v1532_v34 }
  0xd2   : > { %v420_v19 = vmul.f32 %v1167_v13, %v419_v15 }
  0xd4   : > { %v421_v22 = vadd.f32 %v1167_v13, %v420_v19 }
  0xd6   : > { %v425_v29 = vsel %vm424_vm11, %v1167_v13, %v421_v22  ;;  %v727_v13 = vperm.slane %v699_v8, %v1532_v34  ;;  %v728_v22 = vperm.slane %v702_v21, %v1532_v34  ;;  %v837_v21 = vsel %vm413_vm0, %v1504_v33, -inf }
  0xd7   : > { %v430_v30 = vsel %vm427_vm12, %v429_v27, %v425_v29 }
  0xd8   : > { %v1587_v35 = vmul.f32 %v1512_v3, %v430_v30 }
  0xda   : > { %v499_v38 = vmul.f32 %v1280_v2, %v1587_v35  ;;  %v500_v39 = vmul.f32 %v1277_v1, %v1587_v35  ;;  %v501_v40 = vmul.f32 %v1292_v7, %v1587_v35  ;;  %v504_v3 = vmul.f32 %v1298_v9, %v1587_v35 }
  0xdb   : > { %v503_v2 = vmul.f32 %v1289_v6, %v1587_v35  ;;  %v502_v1 = vmul.f32 %v1274_v0, %v1587_v35  ;;  %v622_v50 = vmul.f32 %v1338_v28, %v1587_v35  ;;  %v506_v9 = vmul.f32 %v1325_v23, %v1587_v35 }
  0xdc   : > { %v513_v43 = vsel %vm413_vm0, %v501_v40, 0.0  ;;  %v510_v44 = vsel %vm413_vm0, %v500_v39, 0.0  ;;  %v507_v45 = vsel %vm413_vm0, %v499_v38, 0.0  ;;  %v522_v7 = vsel %vm413_vm0, %v504_v3, 0.0 }
  0xdd   : > { %514 = vadd.xlane.f32.xlu2 %v513_v43  ;;  %511 = vadd.xlane.f32.xlu1 %v510_v44  ;;  %v519_v48 = vsel %vm413_vm0, %v503_v2, 0.0  ;;  %v516_v49 = vsel %vm413_vm0, %v502_v1, 0.0  ;;  %v505_v6 = vmul.f32 %v1318_v20, %v1587_v35  ;;  %v632_v0 = vsel %vm413_vm0, %v622_v50, 0.0 }
  0xde   : > { %508 = vadd.xlane.f32.xlu0 %v507_v45  ;;  %v528_v53 = vsel %vm413_vm0, %v506_v9, 0.0  ;;  %v625_v56 = vmul.f32 %v1363_v42, %v1587_v35  ;;  %v621_v28 = vmul.f32 %v1331_v25, %v1587_v35  ;;  %v623_v23 = vmul.f32 %v1345_v32, %v1587_v35 }
  0xdf   : > { %v525_v54 = vsel %vm413_vm0, %v505_v6, 0.0  ;;  %v628_v60 = vmul.f32 %v1386_v55, %v1587_v35  ;;  %v624_v42 = vmul.f32 %v1354_v37, %v1587_v35  ;;  %v626_v25 = vmul.f32 %v1372_v47, %v1587_v35 }
  0xe0   : > { %v641_v20 = vsel %vm413_vm0, %v625_v56, 0.0  ;;  %v629_v58 = vsel %vm413_vm0, %v621_v28, 0.0  ;;  %v635_v59 = vsel %vm413_vm0, %v623_v23, 0.0  ;;  %v743_v55 = vmul.f32 %v1395_v62, %v1587_v35 }
  0xe1   : > { %v650_v32 = vsel %vm413_vm0, %v628_v60, 0.0  ;;  %v638_v61 = vsel %vm413_vm0, %v624_v42, 0.0  ;;  %v644_v4 = vsel %vm413_vm0, %v626_v25, 0.0  ;;  %v627_v37 = vmul.f32 %v1379_v51, %v1587_v35  ;;  %v708_v51 = vpop.xlane.xlu1 %707 }
  0xe2   : > { %v744_v47 = vmul.f32 %v1402_v5, %v1587_v35  ;;  %v751_v15 = vsel %vm413_vm0, %v743_v55, 0.0  ;;  %v734_v62 = vsel %vm482_vm1, %v727_v13, %v726_v14  ;;  %v705_v5 = vpop.xlane.xlu0 %704  ;;  %v746_v27 = vmul.f32 %v1418_v17, %v1587_v35 }
  0xe3   : > { %v647_v16 = vsel %vm413_vm0, %v627_v37, 0.0  ;;  %v745_v29 = vmul.f32 %v1409_v12, %v1587_v35  ;;  %v729_v30 = vperm.slane %v705_v5, %v1532_v34  ;;  %v747_v38 = vmul.f32 %v1427_v24, %v1587_v35  ;;  %v711_v12 = vpop.xlane.xlu2 %710 }
  0xe4   : > { %v754_v19 = vsel %vm413_vm0, %v744_v47, 0.0  ;;  %v735_v39 = vsel %vm484_vm2, %v728_v22, %v734_v62  ;;  %v730_v40 = vperm.slane %v708_v51, %v1532_v34  ;;  %v760_v44 = vsel %vm413_vm0, %v746_v27, 0.0 }
  0xe5   : > { %523 = vadd.xlane.f32.xlu2 %v522_v7  ;;  %520 = vadd.xlane.f32.xlu1 %v519_v48  ;;  %v736_v43 = vsel %vm486_vm3, %v729_v30, %v735_v39  ;;  %v757_v45 = vsel %vm413_vm0, %v745_v29, 0.0  ;;  %v763_v17 = vsel %vm413_vm0, %v747_v38, 0.0  ;;  %v731_v2 = vperm.slane %v711_v12, %v1532_v34 }
  0xe6   : > { %517 = vadd.xlane.f32.xlu0 %v516_v49  ;;  %v737_v3 = vsel %vm488_vm4, %v730_v40, %v736_v43  ;;  %v749_v48 = vmul.f32 %v1443_v36, %v1587_v35  ;;  %v748_v49 = vmul.f32 %v1436_v31, %v1587_v35  ;;  %v865_v9 = vmul.f32 %v1457_v46, %v1587_v35 }
  0xe7   : > { %v738_v6 = vsel %vm490_vm5, %v731_v2, %v737_v3  ;;  %v867_v46 = vmul.f32 %v1471_v57, %v1587_v35  ;;  %v866_v28 = vmul.f32 %v1464_v52, %v1587_v35  ;;  %v870_v23 = vmul.f32 %v1494_v18, %v1587_v35 }
  0xe8   : > { %v766_v56 = vsel %vm413_vm0, %v748_v49, 0.0  ;;  %v873_v31 = vsel %vm413_vm0, %v865_v9, 0.0  ;;  %v868_v18 = vmul.f32 %v1480_v63, %v1587_v35  ;;  %v834_v51 = vsel %vm413_vm0, %v1499_v26, -inf }
  0xe9   : > { %v717_v24 = vpop.xlane.xlu1 %716  ;;  %v876_v60 = vsel %vm413_vm0, %v866_v28, 0.0  ;;  %v888_v25 = vsel %vm413_vm0, %v870_v23, 0.0  ;;  %v872_v5 = vmul.f32 %v1504_v33, %v1587_v35 }
  0xea   : > { %v733_v1 = vperm.slane %v717_v24, %v1532_v34  ;;  %v714_v7 = vpop.xlane.xlu0 %713  ;;  %v882_v8 = vsel %vm413_vm0, %v868_v18, 0.0 }
  0xeb   : > { %v732_v50 = vperm.slane %v714_v7, %v1532_v34  ;;  %v894_v27 = vsel %vm413_vm0, %v872_v5, 0.0 }
  0xed   : > { %633 = vadd.xlane.f32.xlu2 %v632_v0  ;;  %529 = vadd.xlane.f32.xlu1 %v528_v53  ;;  %v739_v0 = vsel %vm492_vm6, %v732_v50, %v738_v6 }
  0xee   : > { %526 = vadd.xlane.f32.xlu0 %v525_v54  ;;  %v740_v53 = vsel %vm494_vm7, %v733_v1, %v739_v0  ;;  %v769_v54 = vsel %vm413_vm0, %v749_v48, 0.0 }
  0xef   : > { %742 = vst.msk [vmem:[%s1553_s11 + $0x10] sm:$0xff] %vm497_vm8, %v740_v53 }
  0xf1   : > { %v821_v36 = vpop.xlane.xlu1 %820 }
  0xf5   : > { %642 = vadd.xlane.f32.xlu2 %v641_v20  ;;  %630 = vadd.xlane.f32.xlu1 %v629_v58  ;;  %v849_v20 = vperm.slane %v821_v36, %v1532_v34 }
  0xf6   : > { %636 = vadd.xlane.f32.xlu0 %v635_v59  ;;  %v879_v59 = vsel %vm413_vm0, %v867_v46, 0.0 }
  0xfd   : > { %651 = vadd.xlane.f32.xlu2 %v650_v32  ;;  %639 = vadd.xlane.f32.xlu1 %v638_v61  ;;  %v869_v32 = vmul.f32 %v1487_v11, %v1587_v35  ;;  %v750_v61 = vmul.f32 %v1450_v41, %v1587_v35 }
  0xfe   : > { %645 = vadd.xlane.f32.xlu0 %v644_v4 }
  0xff   : > { %v885_v10 = vsel %vm413_vm0, %v869_v32, 0.0  ;;  %v772_v63 = vsel %vm413_vm0, %v750_v61, 0.0 }
 0x101   : > { %v818_v58 = vpop.xlane.xlu0 %817 }
 0x102   : > { %v848_v42 = vperm.slane %v818_v58, %v1532_v34 }
 0x104   : > { %v856_v57 = vsel %vm482_vm1, %v849_v20, %v848_v42  ;;  %v830_v52 = vpop.xlane.xlu1 %829 }
 0x105   : > { %752 = vadd.xlane.f32.xlu2 %v751_v15  ;;  %648 = vadd.xlane.f32.xlu1 %v647_v16  ;;  %v852_v55 = vperm.slane %v830_v52, %v1532_v34  ;;  %v871_v16 = vmul.f32 %v1499_v26, %v1587_v35 }
 0x106   : > { %755 = vadd.xlane.f32.xlu0 %v754_v19 }
 0x107   : > { %v891_v22 = vsel %vm413_vm0, %v871_v16, 0.0 }
 0x10c   : > { %v824_v4 = vpop.xlane.xlu0 %823 }
 0x10d   : > { %761 = vadd.xlane.f32.xlu2 %v760_v44  ;;  %758 = vadd.xlane.f32.xlu1 %v757_v45  ;;  %v850_v37 = vperm.slane %v824_v4, %v1532_v34 }
 0x10e   : > { %764 = vadd.xlane.f32.xlu0 %v763_v17  ;;  %v827_v47 = vpop.xlane.xlu2 %826 }
 0x10f   : > { %v851_v13 = vperm.slane %v827_v47, %v1532_v34  ;;  %v857_v11 = vsel %vm484_vm2, %v850_v37, %v856_v57 }
 0x111   : > { %v858_v14 = vsel %vm486_vm3, %v851_v13, %v857_v11 }
 0x112   : > { %v859_v19 = vsel %vm488_vm4, %v852_v55, %v858_v14 }
 0x114   : > { %v833_v41 = vpop.xlane.xlu1 %832 }
 0x115   : > { %770 = vadd.xlane.f32.xlu2 %v769_v54  ;;  %767 = vadd.xlane.f32.xlu1 %v766_v56  ;;  %v853_v15 = vperm.slane %v833_v41, %v1532_v34 }
 0x116   : > { %874 = vadd.xlane.f32.xlu0 %v873_v31 }
 0x117   : > { %v1709_v62 = vsel %vm490_vm5, %v853_v15, %v859_v19 }
 0x11d   : > { %880 = vadd.xlane.f32.xlu2 %v879_v59  ;;  %877 = vadd.xlane.f32.xlu1 %v876_v60 }
 0x11e   : > { %889 = vadd.xlane.f32.xlu0 %v888_v25 }
 0x125   : > { %883 = vadd.xlane.f32.xlu2 %v882_v8  ;;  %886 = vadd.xlane.f32.xlu1 %v885_v10 }
 0x126   : > { %773 = vadd.xlane.f32.xlu0 %v772_v63 }
 0x12d   : > { %892 = vadd.xlane.f32.xlu2 %v891_v22  ;;  %838 = vmax.xlane.f32.xlu1 %v837_v21 }
 0x12e   : > { %835 = vmax.xlane.f32.xlu0 %v834_v51 }
 0x135   : > { %895 = vadd.xlane.f32.xlu2 %v894_v27 }
 0x150   : > { %v515_v29 = vpop.xlane.xlu2 %514  ;;  %v512_v30 = vpop.xlane.xlu1 %511 }
 0x151   : > { %v509_v38 = vpop.xlane.xlu0 %508  ;;  %v532_v39 = vmul.f32 0.25, %v512_v30  ;;  %v533_v43 = vmul.f32 0.25, %v515_v29 }
 0x152   : > { %v531_v40 = vmul.f32 0.25, %v509_v38 }
 0x153   : > { %v548_v44 = vperm.slane %v532_v39, %v1532_v34  ;;  %v549_v3 = vperm.slane %v533_v43, %v1532_v34 }
 0x154   : > { %v547_v26 = vperm.slane %v531_v40, %v1532_v34 }
 0x156   : > { %v555_v35 = vsel %vm482_vm1, %v548_v44, %v547_v26 }
 0x157   : > { %v556_v7 = vsel %vm484_vm2, %v549_v3, %v555_v35 }
 0x158   : > { %v524_v45 = vpop.xlane.xlu2 %523  ;;  %v521_v17 = vpop.xlane.xlu1 %520 }
 0x159   : > { %v518_v12 = vpop.xlane.xlu0 %517  ;;  %v535_v24 = vmul.f32 0.25, %v521_v17  ;;  %v536_v48 = vmul.f32 0.25, %v524_v45 }
 0x15a   : > { %v534_v33 = vmul.f32 0.25, %v518_v12 }
 0x15b   : > { %v551_v1 = vperm.slane %v535_v24, %v1532_v34  ;;  %v552_v56 = vperm.slane %v536_v48, %v1532_v34 }
 0x15c   : > { %v550_v2 = vperm.slane %v534_v33, %v1532_v34 }
 0x15e   : > { %v557_v49 = vsel %vm486_vm3, %v550_v2, %v556_v7 }
 0x15f   : > { %v558_v53 = vsel %vm488_vm4, %v551_v1, %v557_v49 }
 0x160   : > { %v634_v50 = vpop.xlane.xlu2 %633  ;;  %v530_v9 = vpop.xlane.xlu1 %529  ;;  %v559_v46 = vsel %vm490_vm5, %v552_v56, %v558_v53 }
 0x161   : > { %v538_v6 = vmul.f32 0.25, %v530_v9  ;;  %v527_v0 = vpop.xlane.xlu0 %526  ;;  %v654_v42 = vmul.f32 0.25, %v634_v50 }
 0x162   : > { %v537_v54 = vmul.f32 0.25, %v527_v0 }
 0x163   : > { %v554_v31 = vperm.slane %v538_v6, %v1532_v34  ;;  %v670_v52 = vperm.slane %v654_v42, %v1532_v34 }
 0x164   : > { %v553_v36 = vperm.slane %v537_v54, %v1532_v34 }
 0x166   : > { %v560_v28 = vsel %vm492_vm6, %v553_v36, %v559_v46 }
 0x167   : > { %v561_v23 = vsel %vm494_vm7, %v554_v31, %v560_v28 }
 0x168   : > { %563 = vst.msk [vmem:[%s1553_s11 + $0x20] sm:$0xff] %vm497_vm8, %v561_v23  ;;  %v643_v20 = vpop.xlane.xlu2 %642  ;;  %v631_v58 = vpop.xlane.xlu1 %630 }
 0x169   : > { %v637_v59 = vpop.xlane.xlu0 %636  ;;  %v653_v60 = vmul.f32 0.25, %v631_v58  ;;  %v657_v55 = vmul.f32 0.25, %v643_v20 }
 0x16a   : > { %v655_v25 = vmul.f32 0.25, %v637_v59 }
 0x16b   : > { %v669_v57 = vperm.slane %v653_v60, %v1532_v34  ;;  %v673_v11 = vperm.slane %v657_v55, %v1532_v34 }
 0x16c   : > { %v671_v61 = vperm.slane %v655_v25, %v1532_v34 }
 0x16d   : > { %v677_v10 = vsel %vm482_vm1, %v670_v52, %v669_v57 }
 0x16e   : > { %v678_v47 = vsel %vm484_vm2, %v671_v61, %v677_v10 }
 0x170   : > { %v652_v18 = vpop.xlane.xlu2 %651  ;;  %v640_v32 = vpop.xlane.xlu1 %639 }
 0x171   : > { %v656_v4 = vmul.f32 0.25, %v640_v32  ;;  %v646_v8 = vpop.xlane.xlu0 %645  ;;  %v660_v41 = vmul.f32 0.25, %v652_v18 }
 0x172   : > { %v658_v13 = vmul.f32 0.25, %v646_v8 }
 0x173   : > { %v672_v37 = vperm.slane %v656_v4, %v1532_v34  ;;  %v676_v5 = vperm.slane %v660_v41, %v1532_v34 }
 0x174   : > { %v674_v51 = vperm.slane %v658_v13, %v1532_v34 }
 0x175   : > { %v679_v63 = vsel %vm486_vm3, %v672_v37, %v678_v47 }
 0x176   : > { %v680_v16 = vsel %vm488_vm4, %v673_v11, %v679_v63 }
 0x177   : > { %v681_v27 = vsel %vm490_vm5, %v674_v51, %v680_v16 }
 0x178   : > { %v753_v14 = vpop.xlane.xlu2 %752  ;;  %v649_v15 = vpop.xlane.xlu1 %648 }
 0x179   : > { %v659_v19 = vmul.f32 0.25, %v649_v15  ;;  %v756_v21 = vpop.xlane.xlu0 %755  ;;  %v775_v45 = vmul.f32 0.25, %v753_v14 }
 0x17a   : > { %v776_v17 = vmul.f32 0.25, %v756_v21 }
 0x17b   : > { %v675_v22 = vperm.slane %v659_v19, %v1532_v34  ;;  %v791_v3 = vperm.slane %v775_v45, %v1532_v34 }
 0x17c   : > { %v792_v24 = vperm.slane %v776_v17, %v1532_v34 }
 0x17d   : > { %v682_v29 = vsel %vm492_vm6, %v675_v22, %v681_v27 }
 0x17e   : > { %v683_v30 = vsel %vm494_vm7, %v676_v5, %v682_v29  ;;  %v799_v48 = vsel %vm482_vm1, %v792_v24, %v791_v3 }
 0x17f   : > { %685 = vst.msk [vmem:[%s1553_s11 + $0x28] sm:$0xff] %vm497_vm8, %v683_v30 }
 0x180   : > { %v762_v38 = vpop.xlane.xlu2 %761  ;;  %v759_v39 = vpop.xlane.xlu1 %758 }
 0x181   : > { %v765_v40 = vpop.xlane.xlu0 %764  ;;  %v777_v12 = vmul.f32 0.25, %v759_v39  ;;  %v778_v33 = vmul.f32 0.25, %v762_v38 }
 0x182   : > { %v779_v6 = vmul.f32 0.25, %v765_v40 }
 0x183   : > { %v793_v35 = vperm.slane %v777_v12, %v1532_v34  ;;  %v794_v49 = vperm.slane %v778_v33, %v1532_v34 }
 0x184   : > { %v795_v56 = vperm.slane %v779_v6, %v1532_v34 }
 0x185   : > { %v800_v9 = vsel %vm484_vm2, %v793_v35, %v799_v48 }
 0x186   : > { %v801_v53 = vsel %vm486_vm3, %v794_v49, %v800_v9 }
 0x187   : > { %v802_v46 = vsel %vm488_vm4, %v795_v56, %v801_v53 }
 0x188   : > { %v771_v43 = vpop.xlane.xlu2 %770  ;;  %v768_v44 = vpop.xlane.xlu1 %767 }
 0x189   : > { %v875_v26 = vpop.xlane.xlu0 %874  ;;  %v780_v50 = vmul.f32 0.25, %v768_v44  ;;  %v781_v0 = vmul.f32 0.25, %v771_v43 }
 0x18a   : > { %v897_v60 = vmul.f32 0.25, %v875_v26 }
 0x18b   : > { %v796_v54 = vperm.slane %v780_v50, %v1532_v34  ;;  %v797_v28 = vperm.slane %v781_v0, %v1532_v34 }
 0x18c   : > { %v913_v61 = vperm.slane %v897_v60, %v1532_v34 }
 0x18d   : > { %v803_v58 = vsel %vm490_vm5, %v796_v54, %v802_v46 }
 0x18e   : > { %v804_v18 = vsel %vm492_vm6, %v797_v28, %v803_v58 }
 0x190   : > { %v881_v2 = vpop.xlane.xlu2 %880  ;;  %v878_v1 = vpop.xlane.xlu1 %877 }
 0x191   : > { %v890_v7 = vpop.xlane.xlu0 %889  ;;  %v898_v23 = vmul.f32 0.25, %v878_v1  ;;  %v899_v42 = vmul.f32 0.25, %v881_v2 }
 0x192   : > { %v902_v19 = vmul.f32 0.25, %v890_v7 }
 0x193   : > { %v914_v57 = vperm.slane %v898_v23, %v1532_v34  ;;  %v915_v4 = vperm.slane %v899_v42, %v1532_v34 }
 0x194   : > { %v918_v29 = vperm.slane %v902_v19, %v1532_v34 }
 0x195   : > { %v921_v37 = vsel %vm482_vm1, %v914_v57, %v913_v61 }
 0x196   : > { %v922_v41 = vsel %vm484_vm2, %v915_v4, %v921_v37 }
 0x198   : > { %v884_v31 = vpop.xlane.xlu2 %883  ;;  %v887_v36 = vpop.xlane.xlu1 %886 }
 0x199   : > { %v774_v20 = vpop.xlane.xlu0 %773  ;;  %v900_v52 = vmul.f32 0.25, %v884_v31  ;;  %v901_v8 = vmul.f32 0.25, %v887_v36 }
 0x19a   : > { %v782_v59 = vmul.f32 0.25, %v774_v20 }
 0x19b   : > { %v916_v47 = vperm.slane %v900_v52, %v1532_v34  ;;  %v917_v14 = vperm.slane %v901_v8, %v1532_v34 }
 0x19c   : > { %v798_v25 = vperm.slane %v782_v59, %v1532_v34 }
 0x19d   : > { %v923_v21 = vsel %vm486_vm3, %v916_v47, %v922_v41 }
 0x19e   : > { %v805_v32 = vsel %vm494_vm7, %v798_v25, %v804_v18  ;;  %v924_v22 = vsel %vm488_vm4, %v917_v14, %v923_v21 }
 0x19f   : > { %807 = vst.msk [vmem:[%s1553_s11 + $0x30] sm:$0xff] %vm497_vm8, %v805_v32  ;;  %v925_v38 = vsel %vm490_vm5, %v918_v29, %v924_v22 }
 0x1a0   : > { %v893_v10 = vpop.xlane.xlu2 %892  ;;  %v839_v55 = vpop.xlane.xlu1 %838 }
 0x1a1   : > { %v836_v63 = vpop.xlane.xlu0 %835  ;;  %v855_v13 = vperm.slane %v839_v55, %v1532_v34  ;;  %v903_v15 = vmul.f32 0.25, %v893_v10 }
 0x1a2   : > { %v854_v11 = vperm.slane %v836_v63, %v1532_v34 }
 0x1a3   : > { %v919_v5 = vperm.slane %v903_v15, %v1532_v34 }
 0x1a4   : > { %v861_v16 = vsel %vm492_vm6, %v854_v11, %v1709_v62 }
 0x1a5   : > { %v862_v51 = vsel %vm494_vm7, %v855_v13, %v861_v16  ;;  %v926_v62 = vsel %vm492_vm6, %v919_v5, %v925_v38 }
 0x1a6   : > { %864 = vst.msk [vmem:[%s1553_s11 + $0x18] sm:$0xff] %vm497_vm8, %v862_v51 }
 0x1a8   : > { %v896_v27 = vpop.xlane.xlu2 %895 }
 0x1a9   : > { %v904_v30 = vmul.f32 0.25, %v896_v27 }
 0x1ab   : > { %v920_v39 = vperm.slane %v904_v30, %v1532_v34 }
 0x1ad   : > { %v927_v40 = vsel %vm494_vm7, %v920_v39, %v926_v62 }
 0x1ae   : > { %929 = vst.msk [vmem:[%s1553_s11 + $0x38] sm:$0xff] %vm497_vm8, %v927_v40 }
 0x1af PF: > { %s15_s16 = sadd.s32 1, %s1209_s16   ;;  %s1807_s14 = smov %s1205_s15 }
 0x1b0   : > { %p12_p8 = scmp.ge.s32.totalorder %s15_s16, 4   ;;  %s1808_s15 = smov %s1810_s17 }
 0x1b2   :  { %14 = sbr.rel (!%p12_p8) target bundleno = 4 (0x4), region = 98 }
 0x1b7   :  { %957 = vsyncpa [#allocation4], 1 }
 0x1b8   :  { %959 = vsyncpa [#allocation4 + $0x1], 1 }

</bundles_post_ra>
